<compile_context>
chip_gen: v6e
topology: v6e:2x2x1
jax: 0.10.0
libtpu: 0.0.40
codegen_flags: <defaults>
</compile_context>

<pallas_src>
import math

import numpy as np
import jax
import jax.numpy as jnp
from jax.experimental import pallas as pl
from jax.experimental.pallas import tpu as pltpu


# ----------------------------------------------------------------------------
# Fused Pallas kernel: MSE + all seven (cross_entropy - kl_div) terms
# ----------------------------------------------------------------------------
def _fused_sae_loss_kernel(data_ref, output_ref,
                           d1_ref, o1_ref, d2_ref, o2_ref, d3_ref, o3_ref,
                           mse_ref, h1_ref, h2_ref, h3_ref,
                           h13_ref, h23_ref, h12_ref, h123_ref):
    f32 = jnp.float32

    # ---- 1/2 * MSELoss(reduction='mean') ------------------------------------
    d = data_ref[...].astype(f32)
    o = output_ref[...].astype(f32)
    diff = d - o
    mse = (0.5 / float(diff.size)) * jnp.sum(diff * diff)

    # ---- per-branch, per-row softmax partials --------------------------------
    # For branch b (targets raw_b, logits out_b) keep per row:
    #   md  = max(raw),  zd  = sum exp(raw - md)
    #   spd = sum exp(raw - md) * raw,   spo = sum exp(raw - md) * out
    #   mo  = max(out),  zo  = sum exp(out - mo)
    # Any feature-concatenation of branches is then recombined exactly:
    #   Md = max_b md_b,  Zd = sum_b exp(md_b - Md) * zd_b, etc.
    def branch_partials(raw_ref, logit_ref):
        raw = raw_ref[...].astype(f32)
        logit = logit_ref[...].astype(f32)
        md = jnp.max(raw, axis=-1, keepdims=True)
        ed = jnp.exp(raw - md)
        zd = jnp.sum(ed, axis=-1, keepdims=True)
        spd = jnp.sum(ed * raw, axis=-1, keepdims=True)
        spo = jnp.sum(ed * logit, axis=-1, keepdims=True)
        mo = jnp.max(logit, axis=-1, keepdims=True)
        zo = jnp.sum(jnp.exp(logit - mo), axis=-1, keepdims=True)
        return dict(md=md, zd=zd, spd=spd, spo=spo, mo=mo, zo=zo,
                    n=raw.shape[0], c=raw.shape[1])

    b1 = branch_partials(d1_ref, o1_ref)
    b2 = branch_partials(d2_ref, o2_ref)
    b3 = branch_partials(d3_ref, o3_ref)

    # F.cross_entropy(logits, softmax(raw), reduction='mean')
    #   - F.kl_div(log_softmax(logits), softmax(raw), reduction='mean')
    # over the feature-concatenation of `branches` (no concat materialized).
    def ce_minus_kl(branches):
        n = branches[0]['n']
        c_tot = sum(b['c'] for b in branches)
        Md = branches[0]['md']
        Mo = branches[0]['mo']
        for b in branches[1:]:
            Md = jnp.maximum(Md, b['md'])
            Mo = jnp.maximum(Mo, b['mo'])
        Zd = Zo = Spo = Spd = None
        for b in branches:
            wd = jnp.exp(b['md'] - Md)
            wo = jnp.exp(b['mo'] - Mo)
            Zd = wd * b['zd'] if Zd is None else Zd + wd * b['zd']
            Zo = wo * b['zo'] if Zo is None else Zo + wo * b['zo']
            Spo = wd * b['spo'] if Spo is None else Spo + wd * b['spo']
            Spd = wd * b['spd'] if Spd is None else Spd + wd * b['spd']
        inv_Zd = pl.reciprocal(Zd, approx=False)   # EUP; reused twice per row
        Ep_out = Spo * inv_Zd          # sum_j p_j * logit_j   (p = softmax(raw))
        Ep_raw = Spd * inv_Zd          # sum_j p_j * raw_j
        log_Zd = jnp.log(Zd)
        log_Zo = jnp.log(Zo)
        ce_row = Mo + log_Zo - Ep_out                          # -sum_j p_j lso_j
        kl_row = (Ep_raw - Md - log_Zd) - (Ep_out - Mo - log_Zo)
        ce = (1.0 / float(n)) * jnp.sum(ce_row)            # CE, reduction='mean'
        kl = (1.0 / float(n * c_tot)) * jnp.sum(kl_row)    # kl_div 'mean' (n*c)
        return ce - kl

    h1 = ce_minus_kl([b1])
    h2 = ce_minus_kl([b2])
    h3 = ce_minus_kl([b3])
    h13 = ce_minus_kl([b1, b3])
    h23 = ce_minus_kl([b2, b3])
    h12 = ce_minus_kl([b1, b2])
    h123 = ce_minus_kl([b1, b2, b3])

    mse_ref[...] = jnp.reshape(mse, (1, 1))
    h1_ref[...] = jnp.reshape(h1, (1, 1))
    h2_ref[...] = jnp.reshape(h2, (1, 1))
    h3_ref[...] = jnp.reshape(h3, (1, 1))
    h13_ref[...] = jnp.reshape(h13, (1, 1))
    h23_ref[...] = jnp.reshape(h23, (1, 1))
    h12_ref[...] = jnp.reshape(h12, (1, 1))
    h123_ref[...] = jnp.reshape(h123, (1, 1))


def fused_sae_loss_terms(data, output, data1, output1, data2, output2,
                         data3, output3):
    """Single Pallas launch -> (mse, H_out_1, H_out_2, H_out_3,
                                H_out_1_3, H_out_2_3, H_out_1_2, H_out_123)."""
    inputs = (data, output, data1, output1, data2, output2, data3, output3)
    scalar = jax.ShapeDtypeStruct((1, 1), jnp.float32)
    # NOTE: at realistic SAE sizes, tile the batch axis instead of whole-array
    # blocks (grid=(cdiv(N, TN),), VMEM accumulator + pl.when init/finalize,
    # batch axis marked "parallel" to shard across v7x's 2 TensorCores) and
    # budget the tile against v7x's 64 MiB VMEM. At (8, 16..48) a single block
    # is strictly cheaper.
    outs = pl.pallas_call(
        _fused_sae_loss_kernel,
        out_shape=(scalar,) * 8,
        grid=(1,),
        in_specs=[pl.BlockSpec(x.shape, lambda i: (0, 0)) for x in inputs],
        out_specs=[pl.BlockSpec((1, 1), lambda i: (0, 0)) for _ in range(8)],
        compiler_params=pltpu.CompilerParams(
            dimension_semantics=("arbitrary",)),
    )(*inputs)
    return tuple(r[0, 0] for r in outs)


# ----------------------------------------------------------------------------
# Host-side numpy glue (original code runs this on detach().numpy() data)
# ----------------------------------------------------------------------------
def _entropy_np(probs):
    p = np.asarray(probs, dtype=np.float64)
    p = p[p > 0]
    return float(-np.sum(p * np.log(p)))


def _discretize_np(flat, lower, upper, step):
    # Approximation of pd.cut with right-closed intervals; values exactly on
    # the lowest edge go to the first bin instead of NaN (minor deviation).
    bins = np.arange(lower, upper + step, step)
    labels = bins[:-1] + step / 2.0
    idx = np.ceil((flat - lower) / step - 1e-12).astype(np.int64) - 1
    idx = np.clip(idx, 0, len(labels) - 1)
    return labels[idx]


def average_entropy_np(arr, step, n):
    flat = np.asarray(arr, dtype=np.float64).reshape(-1)
    lower = math.floor(flat.min())
    upper = math.ceil(flat.max())
    disc = _discretize_np(flat, lower, upper, step)
    rows = disc.reshape(-1, n)
    ent = 0.0
    for row in rows:
        _, counts = np.unique(row, return_counts=True)
        ent += _entropy_np(counts / row.size)
    return ent / rows.shape[0], rows


def ave_joint_entropy_np(x, y):
    assert x.shape[1] == y.shape[1]
    total = 0.0
    for r in range(x.shape[0]):
        pairs = np.stack([x[r, :], y[r, :]], axis=1)
        _, counts = np.unique(pairs, axis=0, return_counts=True)
        total += _entropy_np(counts / x.shape[1])
    return total / x.shape[0]


def pad_matrices_np(m1, m2, m3):
    max_cols = max(m1.shape[1], m2.shape[1], m3.shape[1])

    def _pad(m):
        return np.pad(m, ((0, 0), (0, max_cols - m.shape[1])),
                      mode="constant", constant_values=0)

    return _pad(m1), _pad(m2), _pad(m3)


# ----------------------------------------------------------------------------
# Forward pass of SAE_loss_CL
# ----------------------------------------------------------------------------
def sae_loss_cl_forward(data, data1, data2, data3,
                        output1, output2, output3, output,
                        setp=0.175):
    # 1) Dispatch ALL device work first (pallas_call is async), so the slow
    #    host-side histogram-entropy loops below overlap with TPU execution.
    (mse_loss, H_output_1, H_output_2, H_output_3,
     H_out_1_3, H_out_2_3, H_out_1_2, H_output_123) = fused_sae_loss_terms(
         data, output, data1, output1, data2, output2, data3, output3)

    # 2) Host-side discrete-entropy terms (mirrors data*.detach().numpy()).
    d1 = np.asarray(data1, dtype=np.float64)
    d2 = np.asarray(data2, dtype=np.float64)
    d3 = np.asarray(data3, dtype=np.float64)
    H_data_1, D1 = average_entropy_np(d1, setp, d1.shape[1])
    H_data_2, D2 = average_entropy_np(d2, setp, d2.shape[1])
    H_data_3, D3 = average_entropy_np(d3, setp, d3.shape[1])

    X1, X2, X3 = pad_matrices_np(D1, D2, D3)
    H_in_1_3 = ave_joint_entropy_np(X1, X3)
    H_in_2_3 = ave_joint_entropy_np(X2, X3)
    H_in_1_2 = ave_joint_entropy_np(X1, X2)

    # TODO(synk): `cmi(['0'],['1'],['2'],3,df)` (external conditional-mutual-
    # information estimator on discretized pandas data) has no Pallas/JAX
    # equivalent; its contribution (ave_data_ConMI) is set to 0 here.
    ave_data_ConMI = 0.0

    # 3) Combine host scalars with the (now likely finished) device scalars.
    H_1 = H_data_1 - H_output_1
    H_2 = H_data_2 - H_output_2
    H_3 = H_data_3 - H_output_3

    data1_3 = H_data_1 + H_data_3 - H_in_1_3
    data2_3 = H_data_2 + H_data_3 - H_in_2_3
    data1_2 = H_data_1 + H_data_2 - H_in_1_2
    label1_3 = H_output_1 + H_output_3 - H_out_1_3
    label2_3 = H_output_2 + H_output_3 - H_out_2_3
    label1_2 = H_output_1 + H_output_2 - H_out_1_2
    H_MI1_3 = label1_3 - data1_3
    H_MI2_3 = label2_3 - data2_3
    H_MI1_2 = label1_2 - data1_2

    ave_label_ConMI = H_out_2_3 - H_output_3 + H_out_1_3 - H_output_123
    CMI = ave_label_ConMI - ave_data_ConMI

    loss = (9.0 / 10.0) * mse_loss + (1.0 / 10.0) * (
        jnp.square(H_1) + jnp.square(H_2) + jnp.square(H_3)
        + jnp.square(H_MI1_3) + jnp.square(H_MI2_3) + jnp.square(H_MI1_2)
        + jnp.square(CMI))
    return loss


# ----------------------------------------------------------------------------
# Plain-JAX reference for the trickiest fused terms (concat recombination)
# ----------------------------------------------------------------------------
def _ce_minus_kl_ref(logits, raw):
    logits = jnp.asarray(logits, jnp.float32)
    raw = jnp.asarray(raw, jnp.float32)
    n, c = logits.shape
    p = jax.nn.softmax(raw, axis=-1)
    lso = jax.nn.log_softmax(logits, axis=-1)
    log_p = jax.nn.log_softmax(raw, axis=-1)
    ce = jnp.sum(-p * lso) / n
    kl = jnp.sum(p * (log_p - lso)) / (n * c)
    return ce - kl


# ----------------------------------------------------------------------------
if __name__ == "__main__":
    key = jax.random.PRNGKey(0)
    N, C, D = 8, 16, 48  # batch, per-branch features, full feature width

    ks = jax.random.split(key, 8)
    data = jax.random.normal(ks[0], (N, D), dtype=jnp.float32)
    data1 = jax.random.normal(ks[1], (N, C), dtype=jnp.float32)
    data2 = jax.random.normal(ks[2], (N, C), dtype=jnp.float32)
    data3 = jax.random.normal(ks[3], (N, C), dtype=jnp.float32)
    output1 = jax.random.normal(ks[4], (N, C), dtype=jnp.float32)
    output2 = jax.random.normal(ks[5], (N, C), dtype=jnp.float32)
    output3 = jax.random.normal(ks[6], (N, C), dtype=jnp.float32)
    output = jax.random.normal(ks[7], (N, D), dtype=jnp.float32)

    loss = sae_loss_cl_forward(data, data1, data2, data3,
                               output1, output2, output3, output,
                               setp=0.175)
    loss = jax.block_until_ready(loss)
    assert jnp.isfinite(loss), f"non-finite loss: {loss}"

    # Sanity-check the analytic concatenated-softmax recombination inside the
    # fused kernel against a plain-JAX reference (hardest terms: 1_3 and 1_2_3).
    terms = fused_sae_loss_terms(data, output, data1, output1,
                                 data2, output2, data3, output3)
    ref_h13 = _ce_minus_kl_ref(jnp.concatenate([output1, output3], axis=1),
                               jnp.concatenate([data1, data3], axis=1))
    ref_h123 = _ce_minus_kl_ref(
        jnp.concatenate([output1, output2, output3], axis=1),
        jnp.concatenate([data1, data2, data3], axis=1))
    assert jnp.allclose(terms[4], ref_h13, rtol=2e-3, atol=2e-3), \
        f"H_out_1_3 mismatch: {terms[4]} vs {ref_h13}"
    assert jnp.allclose(terms[7], ref_h123, rtol=2e-3, atol=2e-3), \
        f"H_out_123 mismatch: {terms[7]} vs {ref_h123}"

    print("KERNEL_OK")
</pallas_src>

<mosaic_0001>
module attributes {stable_mosaic.version = 11 : i64} {
  func.func @_fused_sae_loss_kernel(%arg0: i32, %arg1: memref<8x48xf32, #tpu.memory_space<vmem>>, %arg2: memref<8x48xf32, #tpu.memory_space<vmem>>, %arg3: memref<8x16xf32, #tpu.memory_space<vmem>>, %arg4: memref<8x16xf32, #tpu.memory_space<vmem>>, %arg5: memref<8x16xf32, #tpu.memory_space<vmem>>, %arg6: memref<8x16xf32, #tpu.memory_space<vmem>>, %arg7: memref<8x16xf32, #tpu.memory_space<vmem>>, %arg8: memref<8x16xf32, #tpu.memory_space<vmem>>, %arg9: memref<1x1xf32, #tpu.memory_space<vmem>>, %arg10: memref<1x1xf32, #tpu.memory_space<vmem>>, %arg11: memref<1x1xf32, #tpu.memory_space<vmem>>, %arg12: memref<1x1xf32, #tpu.memory_space<vmem>>, %arg13: memref<1x1xf32, #tpu.memory_space<vmem>>, %arg14: memref<1x1xf32, #tpu.memory_space<vmem>>, %arg15: memref<1x1xf32, #tpu.memory_space<vmem>>, %arg16: memref<1x1xf32, #tpu.memory_space<vmem>>) attributes {dimension_semantics = [#tpu.dimension_semantics<arbitrary>], iteration_bounds = array<i64: 1>, scalar_prefetch = 0 : i64, scratch_operands = 0 : i64, tpu.core_type = #tpu.core_type<tc>, window_params = [{pipeline_mode = #tpu.pipeline_mode<synchronous>, transform_indices = @transform_0, window_bounds = array<i64: 8, 48>}, {pipeline_mode = #tpu.pipeline_mode<synchronous>, transform_indices = @transform_1, window_bounds = array<i64: 8, 48>}, {pipeline_mode = #tpu.pipeline_mode<synchronous>, transform_indices = @transform_2, window_bounds = array<i64: 8, 16>}, {pipeline_mode = #tpu.pipeline_mode<synchronous>, transform_indices = @transform_3, window_bounds = array<i64: 8, 16>}, {pipeline_mode = #tpu.pipeline_mode<synchronous>, transform_indices = @transform_4, window_bounds = array<i64: 8, 16>}, {pipeline_mode = #tpu.pipeline_mode<synchronous>, transform_indices = @transform_5, window_bounds = array<i64: 8, 16>}, {pipeline_mode = #tpu.pipeline_mode<synchronous>, transform_indices = @transform_6, window_bounds = array<i64: 8, 16>}, {pipeline_mode = #tpu.pipeline_mode<synchronous>, transform_indices = @transform_7, window_bounds = array<i64: 8, 16>}, {pipeline_mode = #tpu.pipeline_mode<synchronous>, transform_indices = @transform_8, window_bounds = array<i64: 1, 1>}, {pipeline_mode = #tpu.pipeline_mode<synchronous>, transform_indices = @transform_9, window_bounds = array<i64: 1, 1>}, {pipeline_mode = #tpu.pipeline_mode<synchronous>, transform_indices = @transform_10, window_bounds = array<i64: 1, 1>}, {pipeline_mode = #tpu.pipeline_mode<synchronous>, transform_indices = @transform_11, window_bounds = array<i64: 1, 1>}, {pipeline_mode = #tpu.pipeline_mode<synchronous>, transform_indices = @transform_12, window_bounds = array<i64: 1, 1>}, {pipeline_mode = #tpu.pipeline_mode<synchronous>, transform_indices = @transform_13, window_bounds = array<i64: 1, 1>}, {pipeline_mode = #tpu.pipeline_mode<synchronous>, transform_indices = @transform_14, window_bounds = array<i64: 1, 1>}, {pipeline_mode = #tpu.pipeline_mode<synchronous>, transform_indices = @transform_15, window_bounds = array<i64: 1, 1>}]} {
    %c0 = arith.constant 0 : index
    %c0_0 = arith.constant 0 : index
    %0 = vector.load %arg1[%c0, %c0_0] : memref<8x48xf32, #tpu.memory_space<vmem>>, vector<8x48xf32>
    %c0_1 = arith.constant 0 : index
    %c0_2 = arith.constant 0 : index
    %1 = vector.load %arg2[%c0_1, %c0_2] : memref<8x48xf32, #tpu.memory_space<vmem>>, vector<8x48xf32>
    %2 = arith.subf %0, %1 : vector<8x48xf32>
    %3 = arith.mulf %2, %2 : vector<8x48xf32>
    %4 = vector.shape_cast %3 : vector<8x48xf32> to vector<1x8x48xf32>
    %cst = arith.constant dense<0.000000e+00> : vector<1xf32>
    %5 = vector.multi_reduction <add>, %4, %cst [1, 2] : vector<1x8x48xf32> to vector<1xf32>
    %6 = vector.shape_cast %5 : vector<1xf32> to vector<1x1x1xf32>
    %7 = vector.extract %6[0, 0, 0] : f32 from vector<1x1x1xf32>
    %cst_3 = arith.constant 0.00130208337 : f32
    %8 = arith.mulf %cst_3, %7 : f32
    %c0_4 = arith.constant 0 : index
    %c0_5 = arith.constant 0 : index
    %9 = vector.load %arg3[%c0_4, %c0_5] : memref<8x16xf32, #tpu.memory_space<vmem>>, vector<8x16xf32>
    %c0_6 = arith.constant 0 : index
    %c0_7 = arith.constant 0 : index
    %10 = vector.load %arg4[%c0_6, %c0_7] : memref<8x16xf32, #tpu.memory_space<vmem>>, vector<8x16xf32>
    %cst_8 = arith.constant dense<0xFF800000> : vector<8xf32>
    %11 = vector.multi_reduction <maximumf>, %9, %cst_8 [1] : vector<8x16xf32> to vector<8xf32>
    %12 = vector.shape_cast %11 : vector<8xf32> to vector<8x1xf32>
    %13 = vector.broadcast %12 : vector<8x1xf32> to vector<8x16xf32>
    %14 = arith.subf %9, %13 : vector<8x16xf32>
    %15 = math.exp %14 : vector<8x16xf32>
    %cst_9 = arith.constant dense<0.000000e+00> : vector<8xf32>
    %16 = vector.multi_reduction <add>, %15, %cst_9 [1] : vector<8x16xf32> to vector<8xf32>
    %17 = vector.shape_cast %16 : vector<8xf32> to vector<8x1xf32>
    %18 = arith.mulf %15, %9 : vector<8x16xf32>
    %cst_10 = arith.constant dense<0.000000e+00> : vector<8xf32>
    %19 = vector.multi_reduction <add>, %18, %cst_10 [1] : vector<8x16xf32> to vector<8xf32>
    %20 = vector.shape_cast %19 : vector<8xf32> to vector<8x1xf32>
    %21 = arith.mulf %15, %10 : vector<8x16xf32>
    %cst_11 = arith.constant dense<0.000000e+00> : vector<8xf32>
    %22 = vector.multi_reduction <add>, %21, %cst_11 [1] : vector<8x16xf32> to vector<8xf32>
    %23 = vector.shape_cast %22 : vector<8xf32> to vector<8x1xf32>
    %cst_12 = arith.constant dense<0xFF800000> : vector<8xf32>
    %24 = vector.multi_reduction <maximumf>, %10, %cst_12 [1] : vector<8x16xf32> to vector<8xf32>
    %25 = vector.shape_cast %24 : vector<8xf32> to vector<8x1xf32>
    %26 = vector.broadcast %25 : vector<8x1xf32> to vector<8x16xf32>
    %27 = arith.subf %10, %26 : vector<8x16xf32>
    %28 = math.exp %27 : vector<8x16xf32>
    %cst_13 = arith.constant dense<0.000000e+00> : vector<8xf32>
    %29 = vector.multi_reduction <add>, %28, %cst_13 [1] : vector<8x16xf32> to vector<8xf32>
    %30 = vector.shape_cast %29 : vector<8xf32> to vector<8x1xf32>
    %c0_14 = arith.constant 0 : index
    %c0_15 = arith.constant 0 : index
    %31 = vector.load %arg5[%c0_14, %c0_15] : memref<8x16xf32, #tpu.memory_space<vmem>>, vector<8x16xf32>
    %c0_16 = arith.constant 0 : index
    %c0_17 = arith.constant 0 : index
    %32 = vector.load %arg6[%c0_16, %c0_17] : memref<8x16xf32, #tpu.memory_space<vmem>>, vector<8x16xf32>
    %cst_18 = arith.constant dense<0xFF800000> : vector<8xf32>
    %33 = vector.multi_reduction <maximumf>, %31, %cst_18 [1] : vector<8x16xf32> to vector<8xf32>
    %34 = vector.shape_cast %33 : vector<8xf32> to vector<8x1xf32>
    %35 = vector.broadcast %34 : vector<8x1xf32> to vector<8x16xf32>
    %36 = arith.subf %31, %35 : vector<8x16xf32>
    %37 = math.exp %36 : vector<8x16xf32>
    %cst_19 = arith.constant dense<0.000000e+00> : vector<8xf32>
    %38 = vector.multi_reduction <add>, %37, %cst_19 [1] : vector<8x16xf32> to vector<8xf32>
    %39 = vector.shape_cast %38 : vector<8xf32> to vector<8x1xf32>
    %40 = arith.mulf %37, %31 : vector<8x16xf32>
    %cst_20 = arith.constant dense<0.000000e+00> : vector<8xf32>
    %41 = vector.multi_reduction <add>, %40, %cst_20 [1] : vector<8x16xf32> to vector<8xf32>
    %42 = vector.shape_cast %41 : vector<8xf32> to vector<8x1xf32>
    %43 = arith.mulf %37, %32 : vector<8x16xf32>
    %cst_21 = arith.constant dense<0.000000e+00> : vector<8xf32>
    %44 = vector.multi_reduction <add>, %43, %cst_21 [1] : vector<8x16xf32> to vector<8xf32>
    %45 = vector.shape_cast %44 : vector<8xf32> to vector<8x1xf32>
    %cst_22 = arith.constant dense<0xFF800000> : vector<8xf32>
    %46 = vector.multi_reduction <maximumf>, %32, %cst_22 [1] : vector<8x16xf32> to vector<8xf32>
    %47 = vector.shape_cast %46 : vector<8xf32> to vector<8x1xf32>
    %48 = vector.broadcast %47 : vector<8x1xf32> to vector<8x16xf32>
    %49 = arith.subf %32, %48 : vector<8x16xf32>
    %50 = math.exp %49 : vector<8x16xf32>
    %cst_23 = arith.constant dense<0.000000e+00> : vector<8xf32>
    %51 = vector.multi_reduction <add>, %50, %cst_23 [1] : vector<8x16xf32> to vector<8xf32>
    %52 = vector.shape_cast %51 : vector<8xf32> to vector<8x1xf32>
    %c0_24 = arith.constant 0 : index
    %c0_25 = arith.constant 0 : index
    %53 = vector.load %arg7[%c0_24, %c0_25] : memref<8x16xf32, #tpu.memory_space<vmem>>, vector<8x16xf32>
    %c0_26 = arith.constant 0 : index
    %c0_27 = arith.constant 0 : index
    %54 = vector.load %arg8[%c0_26, %c0_27] : memref<8x16xf32, #tpu.memory_space<vmem>>, vector<8x16xf32>
    %cst_28 = arith.constant dense<0xFF800000> : vector<8xf32>
    %55 = vector.multi_reduction <maximumf>, %53, %cst_28 [1] : vector<8x16xf32> to vector<8xf32>
    %56 = vector.shape_cast %55 : vector<8xf32> to vector<8x1xf32>
    %57 = vector.broadcast %56 : vector<8x1xf32> to vector<8x16xf32>
    %58 = arith.subf %53, %57 : vector<8x16xf32>
    %59 = math.exp %58 : vector<8x16xf32>
    %cst_29 = arith.constant dense<0.000000e+00> : vector<8xf32>
    %60 = vector.multi_reduction <add>, %59, %cst_29 [1] : vector<8x16xf32> to vector<8xf32>
    %61 = vector.shape_cast %60 : vector<8xf32> to vector<8x1xf32>
    %62 = arith.mulf %59, %53 : vector<8x16xf32>
    %cst_30 = arith.constant dense<0.000000e+00> : vector<8xf32>
    %63 = vector.multi_reduction <add>, %62, %cst_30 [1] : vector<8x16xf32> to vector<8xf32>
    %64 = vector.shape_cast %63 : vector<8xf32> to vector<8x1xf32>
    %65 = arith.mulf %59, %54 : vector<8x16xf32>
    %cst_31 = arith.constant dense<0.000000e+00> : vector<8xf32>
    %66 = vector.multi_reduction <add>, %65, %cst_31 [1] : vector<8x16xf32> to vector<8xf32>
    %67 = vector.shape_cast %66 : vector<8xf32> to vector<8x1xf32>
    %cst_32 = arith.constant dense<0xFF800000> : vector<8xf32>
    %68 = vector.multi_reduction <maximumf>, %54, %cst_32 [1] : vector<8x16xf32> to vector<8xf32>
    %69 = vector.shape_cast %68 : vector<8xf32> to vector<8x1xf32>
    %70 = vector.broadcast %69 : vector<8x1xf32> to vector<8x16xf32>
    %71 = arith.subf %54, %70 : vector<8x16xf32>
    %72 = math.exp %71 : vector<8x16xf32>
    %cst_33 = arith.constant dense<0.000000e+00> : vector<8xf32>
    %73 = vector.multi_reduction <add>, %72, %cst_33 [1] : vector<8x16xf32> to vector<8xf32>
    %74 = vector.shape_cast %73 : vector<8xf32> to vector<8x1xf32>
    %75 = arith.subf %12, %12 : vector<8x1xf32>
    %76 = math.exp %75 : vector<8x1xf32>
    %77 = arith.subf %25, %25 : vector<8x1xf32>
    %78 = math.exp %77 : vector<8x1xf32>
    %79 = arith.mulf %76, %17 : vector<8x1xf32>
    %80 = arith.mulf %78, %30 : vector<8x1xf32>
    %81 = arith.mulf %76, %23 : vector<8x1xf32>
    %82 = arith.mulf %76, %20 : vector<8x1xf32>
    %83 = tpu.reciprocal %79 : vector<8x1xf32> -> vector<8x1xf32>
    %84 = arith.mulf %81, %83 : vector<8x1xf32>
    %85 = arith.mulf %82, %83 : vector<8x1xf32>
    %86 = math.log %79 : vector<8x1xf32>
    %87 = math.log %80 : vector<8x1xf32>
    %88 = arith.addf %25, %87 : vector<8x1xf32>
    %89 = arith.subf %88, %84 : vector<8x1xf32>
    %90 = arith.subf %85, %12 : vector<8x1xf32>
    %91 = arith.subf %90, %86 : vector<8x1xf32>
    %92 = arith.subf %84, %25 : vector<8x1xf32>
    %93 = arith.subf %92, %87 : vector<8x1xf32>
    %94 = arith.subf %91, %93 : vector<8x1xf32>
    %95 = vector.shape_cast %89 : vector<8x1xf32> to vector<1x8x1xf32>
    %cst_34 = arith.constant dense<0.000000e+00> : vector<1xf32>
    %96 = vector.multi_reduction <add>, %95, %cst_34 [1, 2] : vector<1x8x1xf32> to vector<1xf32>
    %97 = vector.shape_cast %96 : vector<1xf32> to vector<1x1x1xf32>
    %98 = vector.extract %97[0, 0, 0] : f32 from vector<1x1x1xf32>
    %cst_35 = arith.constant 1.250000e-01 : f32
    %99 = arith.mulf %cst_35, %98 : f32
    %100 = vector.shape_cast %94 : vector<8x1xf32> to vector<1x8x1xf32>
    %cst_36 = arith.constant dense<0.000000e+00> : vector<1xf32>
    %101 = vector.multi_reduction <add>, %100, %cst_36 [1, 2] : vector<1x8x1xf32> to vector<1xf32>
    %102 = vector.shape_cast %101 : vector<1xf32> to vector<1x1x1xf32>
    %103 = vector.extract %102[0, 0, 0] : f32 from vector<1x1x1xf32>
    %cst_37 = arith.constant 7.812500e-03 : f32
    %104 = arith.mulf %cst_37, %103 : f32
    %105 = arith.subf %99, %104 : f32
    %106 = arith.subf %34, %34 : vector<8x1xf32>
    %107 = math.exp %106 : vector<8x1xf32>
    %108 = arith.subf %47, %47 : vector<8x1xf32>
    %109 = math.exp %108 : vector<8x1xf32>
    %110 = arith.mulf %107, %39 : vector<8x1xf32>
    %111 = arith.mulf %109, %52 : vector<8x1xf32>
    %112 = arith.mulf %107, %45 : vector<8x1xf32>
    %113 = arith.mulf %107, %42 : vector<8x1xf32>
    %114 = tpu.reciprocal %110 : vector<8x1xf32> -> vector<8x1xf32>
    %115 = arith.mulf %112, %114 : vector<8x1xf32>
    %116 = arith.mulf %113, %114 : vector<8x1xf32>
    %117 = math.log %110 : vector<8x1xf32>
    %118 = math.log %111 : vector<8x1xf32>
    %119 = arith.addf %47, %118 : vector<8x1xf32>
    %120 = arith.subf %119, %115 : vector<8x1xf32>
    %121 = arith.subf %116, %34 : vector<8x1xf32>
    %122 = arith.subf %121, %117 : vector<8x1xf32>
    %123 = arith.subf %115, %47 : vector<8x1xf32>
    %124 = arith.subf %123, %118 : vector<8x1xf32>
    %125 = arith.subf %122, %124 : vector<8x1xf32>
    %126 = vector.shape_cast %120 : vector<8x1xf32> to vector<1x8x1xf32>
    %cst_38 = arith.constant dense<0.000000e+00> : vector<1xf32>
    %127 = vector.multi_reduction <add>, %126, %cst_38 [1, 2] : vector<1x8x1xf32> to vector<1xf32>
    %128 = vector.shape_cast %127 : vector<1xf32> to vector<1x1x1xf32>
    %129 = vector.extract %128[0, 0, 0] : f32 from vector<1x1x1xf32>
    %cst_39 = arith.constant 1.250000e-01 : f32
    %130 = arith.mulf %cst_39, %129 : f32
    %131 = vector.shape_cast %125 : vector<8x1xf32> to vector<1x8x1xf32>
    %cst_40 = arith.constant dense<0.000000e+00> : vector<1xf32>
    %132 = vector.multi_reduction <add>, %131, %cst_40 [1, 2] : vector<1x8x1xf32> to vector<1xf32>
    %133 = vector.shape_cast %132 : vector<1xf32> to vector<1x1x1xf32>
    %134 = vector.extract %133[0, 0, 0] : f32 from vector<1x1x1xf32>
    %cst_41 = arith.constant 7.812500e-03 : f32
    %135 = arith.mulf %cst_41, %134 : f32
    %136 = arith.subf %130, %135 : f32
    %137 = arith.subf %56, %56 : vector<8x1xf32>
    %138 = math.exp %137 : vector<8x1xf32>
    %139 = arith.subf %69, %69 : vector<8x1xf32>
    %140 = math.exp %139 : vector<8x1xf32>
    %141 = arith.mulf %138, %61 : vector<8x1xf32>
    %142 = arith.mulf %140, %74 : vector<8x1xf32>
    %143 = arith.mulf %138, %67 : vector<8x1xf32>
    %144 = arith.mulf %138, %64 : vector<8x1xf32>
    %145 = tpu.reciprocal %141 : vector<8x1xf32> -> vector<8x1xf32>
    %146 = arith.mulf %143, %145 : vector<8x1xf32>
    %147 = arith.mulf %144, %145 : vector<8x1xf32>
    %148 = math.log %141 : vector<8x1xf32>
    %149 = math.log %142 : vector<8x1xf32>
    %150 = arith.addf %69, %149 : vector<8x1xf32>
    %151 = arith.subf %150, %146 : vector<8x1xf32>
    %152 = arith.subf %147, %56 : vector<8x1xf32>
    %153 = arith.subf %152, %148 : vector<8x1xf32>
    %154 = arith.subf %146, %69 : vector<8x1xf32>
    %155 = arith.subf %154, %149 : vector<8x1xf32>
    %156 = arith.subf %153, %155 : vector<8x1xf32>
    %157 = vector.shape_cast %151 : vector<8x1xf32> to vector<1x8x1xf32>
    %cst_42 = arith.constant dense<0.000000e+00> : vector<1xf32>
    %158 = vector.multi_reduction <add>, %157, %cst_42 [1, 2] : vector<1x8x1xf32> to vector<1xf32>
    %159 = vector.shape_cast %158 : vector<1xf32> to vector<1x1x1xf32>
    %160 = vector.extract %159[0, 0, 0] : f32 from vector<1x1x1xf32>
    %cst_43 = arith.constant 1.250000e-01 : f32
    %161 = arith.mulf %cst_43, %160 : f32
    %162 = vector.shape_cast %156 : vector<8x1xf32> to vector<1x8x1xf32>
    %cst_44 = arith.constant dense<0.000000e+00> : vector<1xf32>
    %163 = vector.multi_reduction <add>, %162, %cst_44 [1, 2] : vector<1x8x1xf32> to vector<1xf32>
    %164 = vector.shape_cast %163 : vector<1xf32> to vector<1x1x1xf32>
    %165 = vector.extract %164[0, 0, 0] : f32 from vector<1x1x1xf32>
    %cst_45 = arith.constant 7.812500e-03 : f32
    %166 = arith.mulf %cst_45, %165 : f32
    %167 = arith.subf %161, %166 : f32
    %168 = arith.maximumf %12, %56 : vector<8x1xf32>
    %169 = arith.maximumf %25, %69 : vector<8x1xf32>
    %170 = arith.subf %12, %168 : vector<8x1xf32>
    %171 = math.exp %170 : vector<8x1xf32>
    %172 = arith.subf %25, %169 : vector<8x1xf32>
    %173 = math.exp %172 : vector<8x1xf32>
    %174 = arith.mulf %171, %17 : vector<8x1xf32>
    %175 = arith.mulf %173, %30 : vector<8x1xf32>
    %176 = arith.mulf %171, %23 : vector<8x1xf32>
    %177 = arith.mulf %171, %20 : vector<8x1xf32>
    %178 = arith.subf %56, %168 : vector<8x1xf32>
    %179 = math.exp %178 : vector<8x1xf32>
    %180 = arith.subf %69, %169 : vector<8x1xf32>
    %181 = math.exp %180 : vector<8x1xf32>
    %182 = arith.mulf %179, %61 : vector<8x1xf32>
    %183 = arith.addf %174, %182 : vector<8x1xf32>
    %184 = arith.mulf %181, %74 : vector<8x1xf32>
    %185 = arith.addf %175, %184 : vector<8x1xf32>
    %186 = arith.mulf %179, %67 : vector<8x1xf32>
    %187 = arith.addf %176, %186 : vector<8x1xf32>
    %188 = arith.mulf %179, %64 : vector<8x1xf32>
    %189 = arith.addf %177, %188 : vector<8x1xf32>
    %190 = tpu.reciprocal %183 : vector<8x1xf32> -> vector<8x1xf32>
    %191 = arith.mulf %187, %190 : vector<8x1xf32>
    %192 = arith.mulf %189, %190 : vector<8x1xf32>
    %193 = math.log %183 : vector<8x1xf32>
    %194 = math.log %185 : vector<8x1xf32>
    %195 = arith.addf %169, %194 : vector<8x1xf32>
    %196 = arith.subf %195, %191 : vector<8x1xf32>
    %197 = arith.subf %192, %168 : vector<8x1xf32>
    %198 = arith.subf %197, %193 : vector<8x1xf32>
    %199 = arith.subf %191, %169 : vector<8x1xf32>
    %200 = arith.subf %199, %194 : vector<8x1xf32>
    %201 = arith.subf %198, %200 : vector<8x1xf32>
    %202 = vector.shape_cast %196 : vector<8x1xf32> to vector<1x8x1xf32>
    %cst_46 = arith.constant dense<0.000000e+00> : vector<1xf32>
    %203 = vector.multi_reduction <add>, %202, %cst_46 [1, 2] : vector<1x8x1xf32> to vector<1xf32>
    %204 = vector.shape_cast %203 : vector<1xf32> to vector<1x1x1xf32>
    %205 = vector.extract %204[0, 0, 0] : f32 from vector<1x1x1xf32>
    %cst_47 = arith.constant 1.250000e-01 : f32
    %206 = arith.mulf %cst_47, %205 : f32
    %207 = vector.shape_cast %201 : vector<8x1xf32> to vector<1x8x1xf32>
    %cst_48 = arith.constant dense<0.000000e+00> : vector<1xf32>
    %208 = vector.multi_reduction <add>, %207, %cst_48 [1, 2] : vector<1x8x1xf32> to vector<1xf32>
    %209 = vector.shape_cast %208 : vector<1xf32> to vector<1x1x1xf32>
    %210 = vector.extract %209[0, 0, 0] : f32 from vector<1x1x1xf32>
    %cst_49 = arith.constant 3.906250e-03 : f32
    %211 = arith.mulf %cst_49, %210 : f32
    %212 = arith.subf %206, %211 : f32
    %213 = arith.maximumf %34, %56 : vector<8x1xf32>
    %214 = arith.maximumf %47, %69 : vector<8x1xf32>
    %215 = arith.subf %34, %213 : vector<8x1xf32>
    %216 = math.exp %215 : vector<8x1xf32>
    %217 = arith.subf %47, %214 : vector<8x1xf32>
    %218 = math.exp %217 : vector<8x1xf32>
    %219 = arith.mulf %216, %39 : vector<8x1xf32>
    %220 = arith.mulf %218, %52 : vector<8x1xf32>
    %221 = arith.mulf %216, %45 : vector<8x1xf32>
    %222 = arith.mulf %216, %42 : vector<8x1xf32>
    %223 = arith.subf %56, %213 : vector<8x1xf32>
    %224 = math.exp %223 : vector<8x1xf32>
    %225 = arith.subf %69, %214 : vector<8x1xf32>
    %226 = math.exp %225 : vector<8x1xf32>
    %227 = arith.mulf %224, %61 : vector<8x1xf32>
    %228 = arith.addf %219, %227 : vector<8x1xf32>
    %229 = arith.mulf %226, %74 : vector<8x1xf32>
    %230 = arith.addf %220, %229 : vector<8x1xf32>
    %231 = arith.mulf %224, %67 : vector<8x1xf32>
    %232 = arith.addf %221, %231 : vector<8x1xf32>
    %233 = arith.mulf %224, %64 : vector<8x1xf32>
    %234 = arith.addf %222, %233 : vector<8x1xf32>
    %235 = tpu.reciprocal %228 : vector<8x1xf32> -> vector<8x1xf32>
    %236 = arith.mulf %232, %235 : vector<8x1xf32>
    %237 = arith.mulf %234, %235 : vector<8x1xf32>
    %238 = math.log %228 : vector<8x1xf32>
    %239 = math.log %230 : vector<8x1xf32>
    %240 = arith.addf %214, %239 : vector<8x1xf32>
    %241 = arith.subf %240, %236 : vector<8x1xf32>
    %242 = arith.subf %237, %213 : vector<8x1xf32>
    %243 = arith.subf %242, %238 : vector<8x1xf32>
    %244 = arith.subf %236, %214 : vector<8x1xf32>
    %245 = arith.subf %244, %239 : vector<8x1xf32>
    %246 = arith.subf %243, %245 : vector<8x1xf32>
    %247 = vector.shape_cast %241 : vector<8x1xf32> to vector<1x8x1xf32>
    %cst_50 = arith.constant dense<0.000000e+00> : vector<1xf32>
    %248 = vector.multi_reduction <add>, %247, %cst_50 [1, 2] : vector<1x8x1xf32> to vector<1xf32>
    %249 = vector.shape_cast %248 : vector<1xf32> to vector<1x1x1xf32>
    %250 = vector.extract %249[0, 0, 0] : f32 from vector<1x1x1xf32>
    %cst_51 = arith.constant 1.250000e-01 : f32
    %251 = arith.mulf %cst_51, %250 : f32
    %252 = vector.shape_cast %246 : vector<8x1xf32> to vector<1x8x1xf32>
    %cst_52 = arith.constant dense<0.000000e+00> : vector<1xf32>
    %253 = vector.multi_reduction <add>, %252, %cst_52 [1, 2] : vector<1x8x1xf32> to vector<1xf32>
    %254 = vector.shape_cast %253 : vector<1xf32> to vector<1x1x1xf32>
    %255 = vector.extract %254[0, 0, 0] : f32 from vector<1x1x1xf32>
    %cst_53 = arith.constant 3.906250e-03 : f32
    %256 = arith.mulf %cst_53, %255 : f32
    %257 = arith.subf %251, %256 : f32
    %258 = arith.maximumf %12, %34 : vector<8x1xf32>
    %259 = arith.maximumf %25, %47 : vector<8x1xf32>
    %260 = arith.subf %12, %258 : vector<8x1xf32>
    %261 = math.exp %260 : vector<8x1xf32>
    %262 = arith.subf %25, %259 : vector<8x1xf32>
    %263 = math.exp %262 : vector<8x1xf32>
    %264 = arith.mulf %261, %17 : vector<8x1xf32>
    %265 = arith.mulf %263, %30 : vector<8x1xf32>
    %266 = arith.mulf %261, %23 : vector<8x1xf32>
    %267 = arith.mulf %261, %20 : vector<8x1xf32>
    %268 = arith.subf %34, %258 : vector<8x1xf32>
    %269 = math.exp %268 : vector<8x1xf32>
    %270 = arith.subf %47, %259 : vector<8x1xf32>
    %271 = math.exp %270 : vector<8x1xf32>
    %272 = arith.mulf %269, %39 : vector<8x1xf32>
    %273 = arith.addf %264, %272 : vector<8x1xf32>
    %274 = arith.mulf %271, %52 : vector<8x1xf32>
    %275 = arith.addf %265, %274 : vector<8x1xf32>
    %276 = arith.mulf %269, %45 : vector<8x1xf32>
    %277 = arith.addf %266, %276 : vector<8x1xf32>
    %278 = arith.mulf %269, %42 : vector<8x1xf32>
    %279 = arith.addf %267, %278 : vector<8x1xf32>
    %280 = tpu.reciprocal %273 : vector<8x1xf32> -> vector<8x1xf32>
    %281 = arith.mulf %277, %280 : vector<8x1xf32>
    %282 = arith.mulf %279, %280 : vector<8x1xf32>
    %283 = math.log %273 : vector<8x1xf32>
    %284 = math.log %275 : vector<8x1xf32>
    %285 = arith.addf %259, %284 : vector<8x1xf32>
    %286 = arith.subf %285, %281 : vector<8x1xf32>
    %287 = arith.subf %282, %258 : vector<8x1xf32>
    %288 = arith.subf %287, %283 : vector<8x1xf32>
    %289 = arith.subf %281, %259 : vector<8x1xf32>
    %290 = arith.subf %289, %284 : vector<8x1xf32>
    %291 = arith.subf %288, %290 : vector<8x1xf32>
    %292 = vector.shape_cast %286 : vector<8x1xf32> to vector<1x8x1xf32>
    %cst_54 = arith.constant dense<0.000000e+00> : vector<1xf32>
    %293 = vector.multi_reduction <add>, %292, %cst_54 [1, 2] : vector<1x8x1xf32> to vector<1xf32>
    %294 = vector.shape_cast %293 : vector<1xf32> to vector<1x1x1xf32>
    %295 = vector.extract %294[0, 0, 0] : f32 from vector<1x1x1xf32>
    %cst_55 = arith.constant 1.250000e-01 : f32
    %296 = arith.mulf %cst_55, %295 : f32
    %297 = vector.shape_cast %291 : vector<8x1xf32> to vector<1x8x1xf32>
    %cst_56 = arith.constant dense<0.000000e+00> : vector<1xf32>
    %298 = vector.multi_reduction <add>, %297, %cst_56 [1, 2] : vector<1x8x1xf32> to vector<1xf32>
    %299 = vector.shape_cast %298 : vector<1xf32> to vector<1x1x1xf32>
    %300 = vector.extract %299[0, 0, 0] : f32 from vector<1x1x1xf32>
    %cst_57 = arith.constant 3.906250e-03 : f32
    %301 = arith.mulf %cst_57, %300 : f32
    %302 = arith.subf %296, %301 : f32
    %303 = arith.maximumf %12, %34 : vector<8x1xf32>
    %304 = arith.maximumf %25, %47 : vector<8x1xf32>
    %305 = arith.maximumf %303, %56 : vector<8x1xf32>
    %306 = arith.maximumf %304, %69 : vector<8x1xf32>
    %307 = arith.subf %12, %305 : vector<8x1xf32>
    %308 = math.exp %307 : vector<8x1xf32>
    %309 = arith.subf %25, %306 : vector<8x1xf32>
    %310 = math.exp %309 : vector<8x1xf32>
    %311 = arith.mulf %308, %17 : vector<8x1xf32>
    %312 = arith.mulf %310, %30 : vector<8x1xf32>
    %313 = arith.mulf %308, %23 : vector<8x1xf32>
    %314 = arith.mulf %308, %20 : vector<8x1xf32>
    %315 = arith.subf %34, %305 : vector<8x1xf32>
    %316 = math.exp %315 : vector<8x1xf32>
    %317 = arith.subf %47, %306 : vector<8x1xf32>
    %318 = math.exp %317 : vector<8x1xf32>
    %319 = arith.mulf %316, %39 : vector<8x1xf32>
    %320 = arith.addf %311, %319 : vector<8x1xf32>
    %321 = arith.mulf %318, %52 : vector<8x1xf32>
    %322 = arith.addf %312, %321 : vector<8x1xf32>
    %323 = arith.mulf %316, %45 : vector<8x1xf32>
    %324 = arith.addf %313, %323 : vector<8x1xf32>
    %325 = arith.mulf %316, %42 : vector<8x1xf32>
    %326 = arith.addf %314, %325 : vector<8x1xf32>
    %327 = arith.subf %56, %305 : vector<8x1xf32>
    %328 = math.exp %327 : vector<8x1xf32>
    %329 = arith.subf %69, %306 : vector<8x1xf32>
    %330 = math.exp %329 : vector<8x1xf32>
    %331 = arith.mulf %328, %61 : vector<8x1xf32>
    %332 = arith.addf %320, %331 : vector<8x1xf32>
    %333 = arith.mulf %330, %74 : vector<8x1xf32>
    %334 = arith.addf %322, %333 : vector<8x1xf32>
    %335 = arith.mulf %328, %67 : vector<8x1xf32>
    %336 = arith.addf %324, %335 : vector<8x1xf32>
    %337 = arith.mulf %328, %64 : vector<8x1xf32>
    %338 = arith.addf %326, %337 : vector<8x1xf32>
    %339 = tpu.reciprocal %332 : vector<8x1xf32> -> vector<8x1xf32>
    %340 = arith.mulf %336, %339 : vector<8x1xf32>
    %341 = arith.mulf %338, %339 : vector<8x1xf32>
    %342 = math.log %332 : vector<8x1xf32>
    %343 = math.log %334 : vector<8x1xf32>
    %344 = arith.addf %306, %343 : vector<8x1xf32>
    %345 = arith.subf %344, %340 : vector<8x1xf32>
    %346 = arith.subf %341, %305 : vector<8x1xf32>
    %347 = arith.subf %346, %342 : vector<8x1xf32>
    %348 = arith.subf %340, %306 : vector<8x1xf32>
    %349 = arith.subf %348, %343 : vector<8x1xf32>
    %350 = arith.subf %347, %349 : vector<8x1xf32>
    %351 = vector.shape_cast %345 : vector<8x1xf32> to vector<1x8x1xf32>
    %cst_58 = arith.constant dense<0.000000e+00> : vector<1xf32>
    %352 = vector.multi_reduction <add>, %351, %cst_58 [1, 2] : vector<1x8x1xf32> to vector<1xf32>
    %353 = vector.shape_cast %352 : vector<1xf32> to vector<1x1x1xf32>
    %354 = vector.extract %353[0, 0, 0] : f32 from vector<1x1x1xf32>
    %cst_59 = arith.constant 1.250000e-01 : f32
    %355 = arith.mulf %cst_59, %354 : f32
    %356 = vector.shape_cast %350 : vector<8x1xf32> to vector<1x8x1xf32>
    %cst_60 = arith.constant dense<0.000000e+00> : vector<1xf32>
    %357 = vector.multi_reduction <add>, %356, %cst_60 [1, 2] : vector<1x8x1xf32> to vector<1xf32>
    %358 = vector.shape_cast %357 : vector<1xf32> to vector<1x1x1xf32>
    %359 = vector.extract %358[0, 0, 0] : f32 from vector<1x1x1xf32>
    %cst_61 = arith.constant 0.00260416674 : f32
    %360 = arith.mulf %cst_61, %359 : f32
    %361 = arith.subf %355, %360 : f32
    %362 = vector.broadcast %8 : f32 to vector<1x1xf32>
    %c0_62 = arith.constant 0 : index
    %c0_63 = arith.constant 0 : index
    %363 = vector.load %arg9[%c0_62, %c0_63] : memref<1x1xf32, #tpu.memory_space<vmem>>, vector<1x1xf32>
    tpu.vector_store %arg9[%c0_62, %c0_63], %362 {strides = array<i32>} : memref<1x1xf32, #tpu.memory_space<vmem>>, vector<1x1xf32>,
    %364 = vector.broadcast %105 : f32 to vector<1x1xf32>
    %c0_64 = arith.constant 0 : index
    %c0_65 = arith.constant 0 : index
    %365 = vector.load %arg10[%c0_64, %c0_65] : memref<1x1xf32, #tpu.memory_space<vmem>>, vector<1x1xf32>
    tpu.vector_store %arg10[%c0_64, %c0_65], %364 {strides = array<i32>} : memref<1x1xf32, #tpu.memory_space<vmem>>, vector<1x1xf32>,
    %366 = vector.broadcast %136 : f32 to vector<1x1xf32>
    %c0_66 = arith.constant 0 : index
    %c0_67 = arith.constant 0 : index
    %367 = vector.load %arg11[%c0_66, %c0_67] : memref<1x1xf32, #tpu.memory_space<vmem>>, vector<1x1xf32>
    tpu.vector_store %arg11[%c0_66, %c0_67], %366 {strides = array<i32>} : memref<1x1xf32, #tpu.memory_space<vmem>>, vector<1x1xf32>,
    %368 = vector.broadcast %167 : f32 to vector<1x1xf32>
    %c0_68 = arith.constant 0 : index
    %c0_69 = arith.constant 0 : index
    %369 = vector.load %arg12[%c0_68, %c0_69] : memref<1x1xf32, #tpu.memory_space<vmem>>, vector<1x1xf32>
    tpu.vector_store %arg12[%c0_68, %c0_69], %368 {strides = array<i32>} : memref<1x1xf32, #tpu.memory_space<vmem>>, vector<1x1xf32>,
    %370 = vector.broadcast %212 : f32 to vector<1x1xf32>
    %c0_70 = arith.constant 0 : index
    %c0_71 = arith.constant 0 : index
    %371 = vector.load %arg13[%c0_70, %c0_71] : memref<1x1xf32, #tpu.memory_space<vmem>>, vector<1x1xf32>
    tpu.vector_store %arg13[%c0_70, %c0_71], %370 {strides = array<i32>} : memref<1x1xf32, #tpu.memory_space<vmem>>, vector<1x1xf32>,
    %372 = vector.broadcast %257 : f32 to vector<1x1xf32>
    %c0_72 = arith.constant 0 : index
    %c0_73 = arith.constant 0 : index
    %373 = vector.load %arg14[%c0_72, %c0_73] : memref<1x1xf32, #tpu.memory_space<vmem>>, vector<1x1xf32>
    tpu.vector_store %arg14[%c0_72, %c0_73], %372 {strides = array<i32>} : memref<1x1xf32, #tpu.memory_space<vmem>>, vector<1x1xf32>,
    %374 = vector.broadcast %302 : f32 to vector<1x1xf32>
    %c0_74 = arith.constant 0 : index
    %c0_75 = arith.constant 0 : index
    %375 = vector.load %arg15[%c0_74, %c0_75] : memref<1x1xf32, #tpu.memory_space<vmem>>, vector<1x1xf32>
    tpu.vector_store %arg15[%c0_74, %c0_75], %374 {strides = array<i32>} : memref<1x1xf32, #tpu.memory_space<vmem>>, vector<1x1xf32>,
    %376 = vector.broadcast %361 : f32 to vector<1x1xf32>
    %c0_76 = arith.constant 0 : index
    %c0_77 = arith.constant 0 : index
    %377 = vector.load %arg16[%c0_76, %c0_77] : memref<1x1xf32, #tpu.memory_space<vmem>>, vector<1x1xf32>
    tpu.vector_store %arg16[%c0_76, %c0_77], %376 {strides = array<i32>} : memref<1x1xf32, #tpu.memory_space<vmem>>, vector<1x1xf32>,
    return
  }
  func.func @transform_0(%arg0: i32) -> (i32, i32) {
    %c0_i32 = arith.constant 0 : i32
    %c0_i32_0 = arith.constant 0 : i32
    %c0_i32_1 = arith.constant 0 : i32
    return %c0_i32, %c0_i32_0 : i32, i32
  }
  func.func @transform_1(%arg0: i32) -> (i32, i32) {
    %c0_i32 = arith.constant 0 : i32
    %c0_i32_0 = arith.constant 0 : i32
    %c0_i32_1 = arith.constant 0 : i32
    return %c0_i32, %c0_i32_0 : i32, i32
  }
  func.func @transform_2(%arg0: i32) -> (i32, i32) {
    %c0_i32 = arith.constant 0 : i32
    %c0_i32_0 = arith.constant 0 : i32
    %c0_i32_1 = arith.constant 0 : i32
    return %c0_i32, %c0_i32_0 : i32, i32
  }
  func.func @transform_3(%arg0: i32) -> (i32, i32) {
    %c0_i32 = arith.constant 0 : i32
    %c0_i32_0 = arith.constant 0 : i32
    %c0_i32_1 = arith.constant 0 : i32
    return %c0_i32, %c0_i32_0 : i32, i32
  }
  func.func @transform_4(%arg0: i32) -> (i32, i32) {
    %c0_i32 = arith.constant 0 : i32
    %c0_i32_0 = arith.constant 0 : i32
    %c0_i32_1 = arith.constant 0 : i32
    return %c0_i32, %c0_i32_0 : i32, i32
  }
  func.func @transform_5(%arg0: i32) -> (i32, i32) {
    %c0_i32 = arith.constant 0 : i32
    %c0_i32_0 = arith.constant 0 : i32
    %c0_i32_1 = arith.constant 0 : i32
    return %c0_i32, %c0_i32_0 : i32, i32
  }
  func.func @transform_6(%arg0: i32) -> (i32, i32) {
    %c0_i32 = arith.constant 0 : i32
    %c0_i32_0 = arith.constant 0 : i32
    %c0_i32_1 = arith.constant 0 : i32
    return %c0_i32, %c0_i32_0 : i32, i32
  }
  func.func @transform_7(%arg0: i32) -> (i32, i32) {
    %c0_i32 = arith.constant 0 : i32
    %c0_i32_0 = arith.constant 0 : i32
    %c0_i32_1 = arith.constant 0 : i32
    return %c0_i32, %c0_i32_0 : i32, i32
  }
  func.func @transform_8(%arg0: i32) -> (i32, i32) {
    %c0_i32 = arith.constant 0 : i32
    %c0_i32_0 = arith.constant 0 : i32
    %c0_i32_1 = arith.constant 0 : i32
    return %c0_i32, %c0_i32_0 : i32, i32
  }
  func.func @transform_9(%arg0: i32) -> (i32, i32) {
    %c0_i32 = arith.constant 0 : i32
    %c0_i32_0 = arith.constant 0 : i32
    %c0_i32_1 = arith.constant 0 : i32
    return %c0_i32, %c0_i32_0 : i32, i32
  }
  func.func @transform_10(%arg0: i32) -> (i32, i32) {
    %c0_i32 = arith.constant 0 : i32
    %c0_i32_0 = arith.constant 0 : i32
    %c0_i32_1 = arith.constant 0 : i32
    return %c0_i32, %c0_i32_0 : i32, i32
  }
  func.func @transform_11(%arg0: i32) -> (i32, i32) {
    %c0_i32 = arith.constant 0 : i32
    %c0_i32_0 = arith.constant 0 : i32
    %c0_i32_1 = arith.constant 0 : i32
    return %c0_i32, %c0_i32_0 : i32, i32
  }
  func.func @transform_12(%arg0: i32) -> (i32, i32) {
    %c0_i32 = arith.constant 0 : i32
    %c0_i32_0 = arith.constant 0 : i32
    %c0_i32_1 = arith.constant 0 : i32
    return %c0_i32, %c0_i32_0 : i32, i32
  }
  func.func @transform_13(%arg0: i32) -> (i32, i32) {
    %c0_i32 = arith.constant 0 : i32
    %c0_i32_0 = arith.constant 0 : i32
    %c0_i32_1 = arith.constant 0 : i32
    return %c0_i32, %c0_i32_0 : i32, i32
  }
  func.func @transform_14(%arg0: i32) -> (i32, i32) {
    %c0_i32 = arith.constant 0 : i32
    %c0_i32_0 = arith.constant 0 : i32
    %c0_i32_1 = arith.constant 0 : i32
    return %c0_i32, %c0_i32_0 : i32, i32
  }
  func.func @transform_15(%arg0: i32) -> (i32, i32) {
    %c0_i32 = arith.constant 0 : i32
    %c0_i32_0 = arith.constant 0 : i32
    %c0_i32_1 = arith.constant 0 : i32
    return %c0_i32, %c0_i32_0 : i32, i32
  }
}

</mosaic_0001>

<bundles_post_ra>
// kernel: tpu_custom_call.1
= control target key start
LH: loop header
LB: loop body
LE: loop exit
PB: predicated region body
PF: predicated region fallthrough
CT: control target
= control target key end

     0   :  { %21 = vsyncpa [#allocation3], 0  ;;  %s1694_s0 = inlined_call_operand.hbm [shape: f32[8,48], index: 0, kind: input, shape index: {}]   ;;  %s1695_s1 = inlined_call_operand.hbm [shape: f32[8,48], index: 1, kind: input, shape index: {}]   ;;  %s1696_s2 = inlined_call_operand.hbm [shape: f32[8,16], index: 2, kind: input, shape index: {}]   ;;  %s1697_s3 = inlined_call_operand.hbm [shape: f32[8,16], index: 3, kind: input, shape index: {}]   ;;  %s1698_s4 = inlined_call_operand.hbm [shape: f32[8,16], index: 4, kind: input, shape index: {}]   ;;  %s1699_s5 = inlined_call_operand.vmem [shape: f32[8,16], index: 5, kind: input, shape index: {}]   ;;  %s1700_s6 = inlined_call_operand.hbm [shape: f32[8,16], index: 6, kind: input, shape index: {}]   ;;  %s1701_s7 = inlined_call_operand.hbm [shape: f32[8,16], index: 7, kind: input, shape index: {}]   ;;  %s1702_s8 = inlined_call_operand.hbm [shape: f32[1,1], index: 8, kind: output, shape index: {0}]   ;;  %s1703_s9 = inlined_call_operand.hbm [shape: f32[1,1], index: 9, kind: output, shape index: {1}]   ;;  %s1704_s10 = inlined_call_operand.hbm [shape: f32[1,1], index: 10, kind: output, shape index: {2}]   ;;  %s1705_s11 = inlined_call_operand.hbm [shape: f32[1,1], index: 11, kind: output, shape index: {3}]   ;;  %s1706_s12 = inlined_call_operand.hbm [shape: f32[1,1], index: 12, kind: output, shape index: {4}]   ;;  %s1707_s13 = inlined_call_operand.hbm [shape: f32[1,1], index: 13, kind: output, shape index: {5}]   ;;  %s1708_s14 = inlined_call_operand.hbm [shape: f32[1,1], index: 14, kind: output, shape index: {6}]   ;;  %s1709_s15 = inlined_call_operand.hbm [shape: f32[1,1], index: 15, kind: output, shape index: {7}]  }
   0x1   :  { %22 = vsyncpa [#allocation6], 0 }
   0x2   :  { %23 = vsyncpa [#allocation9], 0 }
   0x3   :  { %24 = vsyncpa [#allocation12], 0 }
   0x4   :  { %25 = vsyncpa [#allocation4], 0 }
   0x5   :  { %26 = vsyncpa [#allocation16], 0 }
   0x6   :  { %27 = vsyncpa [#allocation19], 0 }
   0x7   :  { %28 = vsyncpa [#allocation22], 0 }
   0x8   :  { %29 = vsyncpa [#allocation25], 0  ;;  %s1227_s18 = smov [#allocation5]   ;;  %s1228_s20 = smov [#allocation8]  }
   0x9   :  { %s46_s19 = sshll.u32 %s1227_s18, 4  ;;  %s66_s21 = sshll.u32 %s1228_s20, 4  ;;  %s47_s19 = int_to_ptr.vmem [resolvable:$true] %s46_s19  ;;  %s67_s21 = int_to_ptr.vmem [resolvable:$true] %s66_s21 }
   0xa   :  { %s917_s22 = scalar_lea.vmem %s47_s19, 128  ;;  %p922_p1 = scmp.lt.s32.totalorder %s47_s19, %s47_s19 }
   0xb   :  { %p918_p0 = scmp.ne.s32.totalorder %s47_s19, %s917_s22  ;;  %p923_p2 = scmp.lt.s32.totalorder %s917_s22, %s917_s22 }
   0xd   :  { %p924_p3 = por %p923_p2, %p922_p1 }
   0xf   :  { %p925_p4 = pnand %p924_p3, %p918_p0 }
  0x11   :  { %928 = shalt.err (!%p925_p4)
}
  0x12   :  { %49 = dma.hbm_to_vmem [thread:$0]  %s1695_s1, 128, %s47_s19, [#allocation6]  }
  0x13   :  { %s937_s25 = scalar_lea.vmem %s67_s21, 128  ;;  %p942_p6 = scmp.lt.s32.totalorder %s67_s21, %s67_s21 }
  0x14   :  { %p938_p5 = scmp.ne.s32.totalorder %s67_s21, %s937_s25  ;;  %p943_p7 = scmp.lt.s32.totalorder %s937_s25, %s937_s25 }
  0x16   :  { %p944_p8 = por %p943_p7, %p942_p6 }
  0x18   :  { %p945_p9 = pnand %p944_p8, %p938_p5 }
  0x1a   :  { %948 = shalt.err (!%p945_p9)
}
  0x1b   :  { %69 = dma.hbm_to_vmem [thread:$0]  %s1697_s3, 128, %s67_s21, [#allocation9]  }
  0x1c   :  { %s1229_s28 = smov [#allocation11]   ;;  %s1230_s30 = smov [#allocation2]  }
  0x1d   :  { %s88_s29 = sshll.u32 %s1229_s28, 4  ;;  %s36_s16 = sshll.u32 %s1230_s30, 4  ;;  %s89_s29 = int_to_ptr.vmem [resolvable:$true] %s88_s29  ;;  %s37_s16 = int_to_ptr.vmem [resolvable:$true] %s36_s16 }
  0x1e   :  { %s957_s17 = scalar_lea.vmem %s89_s29, 128  ;;  %p962_p11 = scmp.lt.s32.totalorder %s89_s29, %s89_s29 }
  0x1f   :  { %p958_p10 = scmp.ne.s32.totalorder %s89_s29, %s957_s17  ;;  %p963_p12 = scmp.lt.s32.totalorder %s957_s17, %s957_s17 }
  0x21   :  { %p964_p13 = por %p963_p12, %p962_p11 }
  0x23   :  { %p965_p0 = pnand %p964_p13, %p958_p10 }
  0x25   :  { %968 = shalt.err (!%p965_p0)
}
  0x26   :  { %91 = dma.hbm_to_vmem [thread:$0]  %s1700_s6, 128, %s89_s29, [#allocation12]  }
  0x27   :  { %s977_s19 = scalar_lea.vmem %s37_s16, 128  ;;  %p982_p2 = scmp.lt.s32.totalorder %s37_s16, %s37_s16 }
  0x28   :  { %p978_p1 = scmp.ne.s32.totalorder %s37_s16, %s977_s19  ;;  %p983_p3 = scmp.lt.s32.totalorder %s977_s19, %s977_s19 }
  0x2a   :  { %p984_p4 = por %p983_p3, %p982_p2 }
  0x2c   :  { %p985_p5 = pnand %p984_p4, %p978_p1 }
  0x2e   :  { %988 = shalt.err (!%p985_p5)
}
  0x2f   :  { %39 = dma.hbm_to_vmem [thread:$0]  %s1694_s0, 128, %s37_s16, [#allocation3]  }
  0x30   :  { %s1231_s21 = smov [#allocation7]   ;;  %s1232_s23 = smov [#allocation10]  }
  0x31   :  { %s56_s22 = sshll.u32 %s1231_s21, 4  ;;  %s76_s24 = sshll.u32 %s1232_s23, 4  ;;  %s57_s22 = int_to_ptr.vmem [resolvable:$true] %s56_s22  ;;  %s77_s24 = int_to_ptr.vmem [resolvable:$true] %s76_s24 }
  0x32   :  { %s997_s25 = scalar_lea.vmem %s57_s22, 128  ;;  %p1002_p7 = scmp.lt.s32.totalorder %s57_s22, %s57_s22 }
  0x33   :  { %p998_p6 = scmp.ne.s32.totalorder %s57_s22, %s997_s25  ;;  %p1003_p8 = scmp.lt.s32.totalorder %s997_s25, %s997_s25 }
  0x35   :  { %p1004_p9 = por %p1003_p8, %p1002_p7 }
  0x37   :  { %p1005_p10 = pnand %p1004_p9, %p998_p6 }
  0x39   :  { %1008 = shalt.err (!%p1005_p10)
}
  0x3a   :  { %59 = dma.hbm_to_vmem [thread:$0]  %s1696_s2, 128, %s57_s22, [#allocation6]  }
  0x3b   :  { %s1017_s27 = scalar_lea.vmem %s77_s24, 128  ;;  %p1022_p12 = scmp.lt.s32.totalorder %s77_s24, %s77_s24 }
  0x3c   :  { %p1018_p11 = scmp.ne.s32.totalorder %s77_s24, %s1017_s27  ;;  %p1023_p13 = scmp.lt.s32.totalorder %s1017_s27, %s1017_s27 }
  0x3e   :  { %p1024_p0 = por %p1023_p13, %p1022_p12 }
  0x40   :  { %p1025_p1 = pnand %p1024_p0, %p1018_p11 }
  0x42   :  { %1028 = shalt.err (!%p1025_p1)
}
  0x43   :  { %79 = dma.hbm_to_vmem [thread:$0]  %s1698_s4, 128, %s77_s24, [#allocation9]  }
  0x44   :  { %s1233_s29 = smov [#allocation13]  }
  0x45   :  { %s98_s30 = sshll.u32 %s1233_s29, 4  ;;  %s99_s30 = int_to_ptr.vmem [resolvable:$true] %s98_s30 }
  0x46   :  { %s1037_s16 = scalar_lea.vmem %s99_s30, 128  ;;  %p1042_p3 = scmp.lt.s32.totalorder %s99_s30, %s99_s30 }
  0x47   :  { %p1038_p2 = scmp.ne.s32.totalorder %s99_s30, %s1037_s16  ;;  %p1043_p4 = scmp.lt.s32.totalorder %s1037_s16, %s1037_s16 }
  0x49   :  { %p1044_p5 = por %p1043_p4, %p1042_p3 }
  0x4b   :  { %p1045_p6 = pnand %p1044_p5, %p1038_p2 }
  0x4d   :  { %1048 = shalt.err (!%p1045_p6)
}
  0x4e   :  { %101 = dma.hbm_to_vmem [thread:$0]  %s1701_s7, 128, %s99_s30, [#allocation12]  }
  0x4f   :  { %1209 = dma.done.wait [#allocation3], 128  }
  0x50   :  { %1210 = vsyncadd [#allocation3], 4294967168 }
  0x51   :  { %1211 = dma.done.wait [#allocation6], 256  }
  0x52   :  { %1212 = vsyncadd [#allocation6], 4294967040 }
  0x53   :  { %1213 = dma.done.wait [#allocation9], 256  }
  0x54   :  { %1214 = vsyncadd [#allocation9], 4294967040 }
  0x55   :  { %1215 = dma.done.wait [#allocation12], 256  }
  0x56   :  { %1216 = vsyncadd [#allocation12], 4294967040  ;;  %vm141_vm0 = vcmask 130048   ;;  %v1343_v0 = vld [vmem:[#allocation11] sm:$0xff]  ;;  %v139_v1 = vld [vmem:[#allocation7] sm:$0xff]  ;;  %vm127_vm1 = vcmask 392192  }
  0x57   :  { %v140_v2 = vld [vmem:[#allocation8] sm:$0xff]  ;;  %v198_v3 = vsel %vm141_vm0, %v1343_v0, -inf  ;;  %v142_v4 = vsel %vm141_vm0, %v139_v1, -inf  ;;  %v168_v5 = vld [vmem:[#allocation10] sm:$0xff]  ;;  %v197_v8 = vld [vmem:[#allocation13] sm:$0xff]  ;;  %vm248_vm2 = vcmask 7168  }
  0x58   :  { %199 = vmax.xlane.f32.xlu1 %v198_v3  ;;  %143 = vmax.xlane.f32.xlu0 %v142_v4  ;;  %v159_v6 = vsel %vm141_vm0, %v140_v2, -inf  ;;  %v170_v7 = vsel %vm141_vm0, %v168_v5, -inf  ;;  %v169_v9 = vld [vmem:[%s1699_s5] sm:$0xff]  ;;  %v215_v10 = vsel %vm141_vm0, %v197_v8, -inf  ;;  %v124_v55 = vld [vmem:[#allocation5] sm:$0xff]  ;;  %vm633_vm3 = vcmask 0  }
  0x59   :  { %v187_v11 = vsel %vm141_vm0, %v169_v9, -inf  ;;  %v123_v54 = vld [vmem:[#allocation2] sm:$0xff]  ;;  %s1234_s18 = smov [#allocation14]  }
  0x5a   :  { %v125_v56 = vsub.f32 %v123_v54, %v124_v55  ;;  %s655_s19 = sshll.u32 %s1234_s18, 4  ;;  %s656_s19 = int_to_ptr.vmem [resolvable:$true] %s655_s19 }
  0x5b   :  { %s1049_s3 = scalar_lea.vmem %s656_s19, 16  ;;  %s1053_s20 = scalar_lea.vmem %s656_s19, 32 }
  0x5c   :  { %160 = vmax.xlane.f32.xlu1 %v159_v6  ;;  %171 = vmax.xlane.f32.xlu0 %v170_v7  ;;  %v126_v57 = vmul.f32 %v125_v56, %v125_v56  ;;  %p1050_p7 = scmp.ne.s32.totalorder %s656_s19, %s1049_s3  ;;  %p1054_p8 = scmp.lt.s32.totalorder %s656_s19, %s656_s19 }
  0x5d   :  { %p1055_p9 = scmp.lt.s32.totalorder %s1053_s20, %s1049_s3 }
  0x5e   :  { %v128_v58 = vsel %vm127_vm1, %v126_v57, 0.0 }
  0x5f   :  { %p1056_p10 = por %p1055_p9, %p1054_p8 }
  0x60   :  { %216 = vmax.xlane.f32.xlu1 %v215_v10  ;;  %188 = vmax.xlane.f32.xlu0 %v187_v11 }
  0x61   :  { %p1057_p11 = pnand %p1056_p10, %p1050_p7 }
  0xe1   :  { %v1355_v12 = vpop.xlane.xlu1 %199  ;;  %v1357_v13 = vpop.xlane.xlu0 %143 }
  0xe2   :  { %v201_v14 = vsub.f32 %v1343_v0, %v1355_v12  ;;  %v145_v15 = vsub.f32 %v139_v1, %v1357_v13  ;;  %v1389_v59 = vmax.f32 %v1357_v13, %v1355_v12  ;;  %v319_v60 = vsub.f32 %v1355_v12, %v1355_v12 }
  0xe3   :  { %v224_v61 = vsub.f32 %v1357_v13, %v1357_v13 }
  0xe4   :  { %v202_v16 = vmul.f32 1.442695, %v201_v14  ;;  %v146_v17 = vmul.f32 1.442695, %v145_v15 }
  0xe5   :  { %v1362_v18 = vpop.xlane.xlu0 %171  ;;  %v1365_v20 = vpop.xlane.xlu1 %160  ;;  %v225_v4 = vmul.f32 1.442695, %v224_v61 }
  0xe6   :  { %v173_v19 = vsub.f32 %v168_v5, %v1362_v18  ;;  %807 = vpow2.f32 %v202_v16  ;;  %v162_v23 = vsub.f32 %v140_v2, %v1365_v20  ;;  %v1397_v62 = vmax.f32 %v1362_v18, %v1355_v12 }
  0xe7   :  { %809 = vpow2.f32 %v146_v17  ;;  %v1401_v63 = vmax.f32 %v1357_v13, %v1362_v18  ;;  %v272_v3 = vsub.f32 %v1362_v18, %v1362_v18 }
  0xe8   :  { %v174_v21 = vmul.f32 1.442695, %v173_v19  ;;  %v163_v27 = vmul.f32 1.442695, %v162_v23 }
  0xe9   :  { %v1367_v22 = vpop.xlane.xlu0 %188  ;;  %v1370_v24 = vpop.xlane.xlu1 %216  ;;  %v1413_v6 = vmax.f32 %v1401_v63, %v1355_v12  ;;  %v494_v10 = vsub.f32 %v1357_v13, %v1401_v63  ;;  %v273_v14 = vmul.f32 1.442695, %v272_v3  ;;  %v504_v15 = vsub.f32 %v1362_v18, %v1401_v63 }
  0xea   :  { %811 = vpow2.f32 %v174_v21  ;;  %v190_v25 = vsub.f32 %v169_v9, %v1367_v22  ;;  %v218_v26 = vsub.f32 %v197_v8, %v1370_v24  ;;  %v1421_v11 = vmax.f32 %v1365_v20, %v1367_v22 }
  0xeb   :  { %813 = vpow2.f32 %v163_v27  ;;  %v557_v17 = vsub.f32 %v1357_v13, %v1413_v6  ;;  %v1429_v19 = vmax.f32 %v1365_v20, %v1370_v24  ;;  %v567_v23 = vsub.f32 %v1362_v18, %v1413_v6 }
  0xec   :  { %v191_v28 = vmul.f32 1.442695, %v190_v25  ;;  %v219_v29 = vmul.f32 1.442695, %v218_v26  ;;  %v495_v25 = vmul.f32 1.442695, %v494_v10  ;;  %v581_v26 = vsub.f32 %v1355_v12, %v1413_v6 }
  0xed   :  { %v1437_v27 = vmax.f32 %v1421_v11, %v1370_v24 }
  0xee   :  { %815 = vpow2.f32 %v191_v28  ;;  %v505_v28 = vmul.f32 1.442695, %v504_v15 }
  0xef   :  { %817 = vpow2.f32 %v219_v29  ;;  %v227_v29 = vsub.f32 %v1365_v20, %v1365_v20  ;;  %v584_v55 = vsub.f32 %v1370_v24, %v1437_v27 }
  0xf1   :  { %v585_v3 = vmul.f32 1.442695, %v584_v55 }
  0xf3   :  { %v808_v30 = vpop.eup %807 }
  0xf4   :  { %v810_v31 = vpop.eup %809  ;;  %v204_v33 = vsel %vm141_vm0, %v808_v30, 0.0  ;;  %v207_v49 = vmul.f32 %v808_v30, %v1343_v0  ;;  %v211_v51 = vmul.f32 %v808_v30, %v197_v8  ;;  %v368_v0 = vsub.f32 %v1357_v13, %v1389_v59 }
  0xf5   :  { %v148_v32 = vsel %vm141_vm0, %v810_v31, 0.0  ;;  %v151_v41 = vmul.f32 %v810_v31, %v139_v1  ;;  %v155_v43 = vmul.f32 %v810_v31, %v140_v2  ;;  %v378_v1 = vsub.f32 %v1355_v12, %v1389_v59 }
  0xf6   :  { %149 = vadd.xlane.f32.xlu0 %v148_v32  ;;  %v208_v52 = vsel %vm141_vm0, %v207_v49, 0.0  ;;  %v212_v53 = vsel %vm141_vm0, %v211_v51, 0.0  ;;  %v320_v2 = vmul.f32 1.442695, %v319_v60  ;;  %v369_v7 = vmul.f32 1.442695, %v368_v0 }
  0xf7   :  { %v812_v34 = vpop.eup %811  ;;  %v152_v44 = vsel %vm141_vm0, %v151_v41, 0.0  ;;  %v156_v46 = vsel %vm141_vm0, %v155_v43, 0.0  ;;  %v441_v8 = vsub.f32 %v1355_v12, %v1397_v62  ;;  %v558_v30 = vmul.f32 1.442695, %v557_v17 }
  0xf8   :  { %v176_v35 = vsel %vm141_vm0, %v812_v34, 0.0  ;;  %v814_v36 = vpop.eup %813  ;;  %v179_v45 = vmul.f32 %v812_v34, %v168_v5  ;;  %v183_v47 = vmul.f32 %v812_v34, %v169_v9  ;;  %v431_v5 = vsub.f32 %v1362_v18, %v1397_v62 }
  0xf9   :  { %177 = vadd.xlane.f32.xlu1 %v176_v35  ;;  %v165_v38 = vsel %vm141_vm0, %v814_v36, 0.0  ;;  %v379_v9 = vmul.f32 1.442695, %v378_v1  ;;  %819 = vpow2.f32 %v320_v2  ;;  %v442_v21 = vmul.f32 1.442695, %v441_v8 }
  0xfa   :  { %205 = vadd.xlane.f32.xlu0 %v204_v33  ;;  %v180_v48 = vsel %vm141_vm0, %v179_v45, 0.0  ;;  %v184_v50 = vsel %vm141_vm0, %v183_v47, 0.0  ;;  %821 = vpow2.f32 %v225_v4  ;;  %v432_v16 = vmul.f32 1.442695, %v431_v5 }
  0xfb   :  { %v816_v37 = vpop.eup %815  ;;  %823 = vpow2.f32 %v369_v7  ;;  %v1443_v31 = vmax.f32 %v1367_v22, %v1370_v24  ;;  %v371_v32 = vsub.f32 %v1365_v20, %v1429_v19  ;;  %v568_v33 = vmul.f32 1.442695, %v567_v23 }
  0xfc   :  { %v818_v39 = vpop.eup %817  ;;  %v193_v40 = vsel %vm141_vm0, %v816_v37, 0.0  ;;  %825 = vpow2.f32 %v379_v9  ;;  %v497_v34 = vsub.f32 %v1365_v20, %v1421_v11  ;;  %v582_v35 = vmul.f32 1.442695, %v581_v26 }
  0xfd   :  { %166 = vadd.xlane.f32.xlu1 %v165_v38  ;;  %v221_v42 = vsel %vm141_vm0, %v818_v39, 0.0  ;;  %827 = vpow2.f32 %v273_v14  ;;  %v560_v36 = vsub.f32 %v1365_v20, %v1437_v27  ;;  %v228_v37 = vmul.f32 1.442695, %v227_v29 }
  0xfe   :  { %194 = vadd.xlane.f32.xlu0 %v193_v40  ;;  %829 = vpow2.f32 %v432_v16  ;;  %v275_v38 = vsub.f32 %v1367_v22, %v1367_v22  ;;  %v372_v39 = vmul.f32 1.442695, %v371_v32  ;;  %v434_v40 = vsub.f32 %v1367_v22, %v1443_v31 }
  0xff   :  { %831 = vpow2.f32 %v442_v21  ;;  %v498_v41 = vmul.f32 1.442695, %v497_v34  ;;  %v561_v43 = vmul.f32 1.442695, %v560_v36  ;;  %v381_v49 = vsub.f32 %v1370_v24, %v1429_v19 }
 0x100   :  { %833 = vpow2.f32 %v495_v25  ;;  %v276_v45 = vmul.f32 1.442695, %v275_v38 }
 0x101   :  { %222 = vadd.xlane.f32.xlu1 %v221_v42  ;;  %835 = vpow2.f32 %v505_v28  ;;  %v507_v42 = vsub.f32 %v1367_v22, %v1421_v11  ;;  %v382_v60 = vmul.f32 1.442695, %v381_v49 }
 0x102   :  { %153 = vadd.xlane.f32.xlu0 %v152_v44  ;;  %837 = vpow2.f32 %v558_v30  ;;  %v570_v44 = vsub.f32 %v1367_v22, %v1437_v27 }
 0x103   :  { %839 = vpow2.f32 %v568_v33  ;;  %v508_v51 = vmul.f32 1.442695, %v507_v42 }
 0x104   :  { %841 = vpow2.f32 %v582_v35  ;;  %v571_v54 = vmul.f32 1.442695, %v570_v44 }
 0x105   :  { %157 = vadd.xlane.f32.xlu1 %v156_v46  ;;  %843 = vpow2.f32 %v228_v37  ;;  %v322_v46 = vsub.f32 %v1370_v24, %v1370_v24 }
 0x106   :  { %181 = vadd.xlane.f32.xlu0 %v180_v48  ;;  %v1461_v47 = vpop.eup %819  ;;  %845 = vpow2.f32 %v372_v39  ;;  %v435_v48 = vmul.f32 1.442695, %v434_v40 }
 0x107   :  { %847 = vpow2.f32 %v498_v41  ;;  %v323_v57 = vmul.f32 1.442695, %v322_v46 }
 0x108   :  { %849 = vpow2.f32 %v561_v43 }
 0x109   :  { %185 = vadd.xlane.f32.xlu1 %v184_v50  ;;  %v1465_v50 = vpop.eup %821  ;;  %851 = vpow2.f32 %v276_v45 }
 0x10a   :  { %209 = vadd.xlane.f32.xlu0 %v208_v52  ;;  %v444_v52 = vsub.f32 %v1370_v24, %v1443_v31  ;;  %853 = vpow2.f32 %v435_v48 }
 0x10c   :  { %v445_v1 = vmul.f32 1.442695, %v444_v52 }
 0x10d   :  { %213 = vadd.xlane.f32.xlu1 %v212_v53  ;;  %v1469_v53 = vpop.eup %823  ;;  %855 = vpow2.f32 %v508_v51 }
 0x10e   :  { %129 = vadd.xlane.f32.xlu0 %v128_v58  ;;  %v1473_v56 = vpop.eup %825  ;;  %857 = vpow2.f32 %v571_v54 }
 0x10f   :  { %v1475_v58 = vpop.eup %827  ;;  %859 = vpow2.f32 %v323_v57 }
 0x110   :  { %v1477_v61 = vpop.eup %829  ;;  %861 = vpow2.f32 %v382_v60 }
 0x111   :  { %v1479_v2 = vpop.eup %831  ;;  %863 = vpow2.f32 %v445_v1 }
 0x112   :  { %v1481_v4 = vpop.eup %833  ;;  %865 = vpow2.f32 %v585_v3 }
 0x113   :  { %v1484_v7 = vpop.eup %835 }
 0x114   :  { %v1486_v8 = vpop.eup %837 }
 0x115   :  { %v1488_v14 = vpop.eup %839 }
 0x116   :  { %v1493_v21 = vpop.eup %841 }
 0x117   :  { %v844_v26 = vpop.eup %843 }
 0x118   :  { %v846_v32 = vpop.eup %845 }
 0x119   :  { %v848_v36 = vpop.eup %847 }
 0x11a   :  { %v850_v37 = vpop.eup %849 }
 0x11b   :  { %v852_v40 = vpop.eup %851 }
 0x11c   :  { %v854_v41 = vpop.eup %853 }
 0x11d   :  { %v856_v44 = vpop.eup %855 }
 0x11e   :  { %v858_v46 = vpop.eup %857 }
 0x11f   :  { %v860_v51 = vpop.eup %859 }
 0x120   :  { %v862_v54 = vpop.eup %861 }
 0x17f   :  { %v150_v0 = vpop.xlane.xlu0 %149 }
 0x180   :  { %v230_v5 = vmul.f32 %v1465_v50, %v150_v0  ;;  %v500_v15 = vmul.f32 %v1481_v4, %v150_v0  ;;  %v374_v28 = vmul.f32 %v1469_v53, %v150_v0  ;;  %v563_v29 = vmul.f32 %v1486_v8, %v150_v0  ;;  %v864_v0 = vpop.eup %863 }
 0x182   :  { %v178_v9 = vpop.xlane.xlu1 %177  ;;  %867 = vrcp.f32 %v230_v5 }
 0x183   :  { %v206_v10 = vpop.xlane.xlu0 %205  ;;  %v278_v16 = vmul.f32 %v1475_v58, %v178_v9  ;;  %v510_v17 = vmul.f32 %v1484_v7, %v178_v9  ;;  %v573_v23 = vmul.f32 %v1488_v14, %v178_v9  ;;  %869 = vlog2.f32 %v230_v5 }
 0x184   :  { %v384_v25 = vmul.f32 %v1473_v56, %v206_v10  ;;  %v437_v33 = vmul.f32 %v1477_v61, %v178_v9  ;;  %v325_v34 = vmul.f32 %v1461_v47, %v206_v10  ;;  %v447_v35 = vmul.f32 %v1479_v2, %v206_v10  ;;  %v866_v9 = vpop.eup %865 }
 0x185   :  { %v511_v30 = vadd.f32 %v510_v17, %v500_v15  ;;  %871 = vrcp.f32 %v278_v16  ;;  %v574_v38 = vadd.f32 %v573_v23, %v563_v29  ;;  %v587_v43 = vmul.f32 %v1493_v21, %v206_v10 }
 0x186   :  { %873 = vlog2.f32 %v278_v16  ;;  %v385_v39 = vadd.f32 %v384_v25, %v374_v28  ;;  %v448_v42 = vadd.f32 %v447_v35, %v437_v33  ;;  %v167_v45 = vpop.xlane.xlu1 %166 }
 0x187   :  { %875 = vrcp.f32 %v511_v30  ;;  %v588_v48 = vadd.f32 %v587_v43, %v574_v38  ;;  %v195_v49 = vpop.xlane.xlu0 %194  ;;  %v231_v52 = vmul.f32 %v844_v26, %v167_v45  ;;  %v501_v55 = vmul.f32 %v848_v36, %v167_v45 }
 0x188   :  { %877 = vlog2.f32 %v511_v30  ;;  %v279_v57 = vmul.f32 %v852_v40, %v195_v49  ;;  %v512_v60 = vmul.f32 %v856_v44, %v195_v49  ;;  %v564_v1 = vmul.f32 %v850_v37, %v167_v45 }
 0x189   :  { %879 = vrcp.f32 %v325_v34  ;;  %v575_v3 = vmul.f32 %v858_v46, %v195_v49  ;;  %v375_v10 = vmul.f32 %v846_v32, %v167_v45  ;;  %v438_v15 = vmul.f32 %v854_v41, %v195_v49 }
 0x18a   :  { %881 = vlog2.f32 %v325_v34  ;;  %v223_v5 = vpop.xlane.xlu1 %222  ;;  %v513_v30 = vadd.f32 %v512_v60, %v501_v55 }
 0x18b   :  { %883 = vrcp.f32 %v385_v39  ;;  %v326_v16 = vmul.f32 %v860_v51, %v223_v5  ;;  %v154_v17 = vpop.xlane.xlu0 %153  ;;  %v386_v25 = vmul.f32 %v862_v54, %v223_v5  ;;  %v449_v26 = vmul.f32 %v864_v0, %v223_v5 }
 0x18c   :  { %885 = vlog2.f32 %v385_v39  ;;  %v589_v28 = vmul.f32 %v866_v9, %v223_v5  ;;  %v576_v34 = vadd.f32 %v575_v3, %v564_v1  ;;  %v233_v32 = vmul.f32 %v1465_v50, %v154_v17 }
 0x18d   :  { %887 = vrcp.f32 %v448_v42  ;;  %v387_v35 = vadd.f32 %v386_v25, %v375_v10  ;;  %v450_v36 = vadd.f32 %v449_v26, %v438_v15  ;;  %v503_v46 = vmul.f32 %v1481_v4, %v154_v17 }
 0x18e   :  { %889 = vlog2.f32 %v448_v42  ;;  %v158_v37 = vpop.xlane.xlu1 %157  ;;  %v590_v41 = vadd.f32 %v589_v28, %v576_v34  ;;  %v377_v42 = vmul.f32 %v1469_v53, %v154_v17  ;;  %v566_v51 = vmul.f32 %v1486_v8, %v154_v17 }
 0x18f   :  { %891 = vrcp.f32 %v588_v48  ;;  %v868_v23 = vpop.eup %867  ;;  %v182_v39 = vpop.xlane.xlu0 %181  ;;  %v232_v43 = vmul.f32 %v1465_v50, %v158_v37  ;;  %v1520_v50 = vmul.f32 %v1481_v4, %v158_v37  ;;  %v1523_v60 = vmul.f32 %v1486_v8, %v158_v37 }
 0x190   :  { %893 = vlog2.f32 %v231_v52  ;;  %v870_v29 = vpop.eup %869  ;;  %v236_v45 = vmul.f32 %v868_v23, %v233_v32  ;;  %v376_v52 = vmul.f32 %v1469_v53, %v158_v37  ;;  %v579_v54 = vmul.f32 %v1488_v14, %v182_v39 }
 0x191   :  { %895 = vlog2.f32 %v279_v57  ;;  %v281_v0 = vmul.f32 %v1475_v58, %v182_v39  ;;  %v440_v53 = vmul.f32 %v1477_v61, %v182_v39  ;;  %v235_v10 = vmul.f32 %v868_v23, %v232_v43 }
 0x192   :  { %v872_v33 = vpop.eup %871  ;;  %897 = vlog2.f32 %v588_v48  ;;  %v516_v48 = vmul.f32 %v1484_v7, %v182_v39  ;;  %v186_v55 = vpop.xlane.xlu1 %185  ;;  %v238_v17 = vmul.f32 0.6931472, %v870_v29  ;;  %v243_v29 = vsub.f32 %v236_v45, %v1357_v13 }
 0x193   :  { %v1503_v38 = vpop.eup %873  ;;  %899 = vlog2.f32 %v326_v16  ;;  %v280_v1 = vmul.f32 %v1475_v58, %v186_v55  ;;  %v210_v3 = vpop.xlane.xlu0 %209  ;;  %v284_v16 = vmul.f32 %v872_v33, %v281_v0  ;;  %v1536_v58 = vadd.f32 %v579_v54, %v566_v51 }
 0x194   :  { %v1506_v40 = vpop.eup %875  ;;  %901 = vlog2.f32 %v387_v35  ;;  %v328_v9 = vmul.f32 %v1461_v47, %v210_v3  ;;  %v1531_v4 = vadd.f32 %v516_v48, %v503_v46  ;;  %v390_v8 = vmul.f32 %v1473_v56, %v210_v3 }
 0x195   :  { %v1510_v44 = vpop.eup %877  ;;  %903 = vlog2.f32 %v513_v30  ;;  %v439_v26 = vmul.f32 %v1477_v61, %v186_v55  ;;  %v453_v28 = vmul.f32 %v1479_v2, %v210_v3  ;;  %v283_v34 = vmul.f32 %v872_v33, %v280_v1 }
 0x196   :  { %v880_v49 = vpop.eup %879  ;;  %905 = vlog2.f32 %v450_v36  ;;  %v214_v30 = vpop.xlane.xlu1 %213  ;;  %v1543_v35 = vmul.f32 %v1484_v7, %v186_v55  ;;  %v391_v36 = vadd.f32 %v390_v8, %v377_v42  ;;  %v577_v39 = vmul.f32 %v1488_v14, %v186_v55 }
 0x197   :  { %v1517_v57 = vpop.eup %881  ;;  %907 = vlog2.f32 %v590_v41  ;;  %v327_v37 = vmul.f32 %v1461_v47, %v214_v30  ;;  %v331_v41 = vmul.f32 %v880_v49, %v328_v9  ;;  %v1551_v61 = vmul.f32 %v1493_v21, %v210_v3 }
 0x198   :  { %v884_v5 = vpop.eup %883  ;;  %v388_v33 = vmul.f32 %v1473_v56, %v214_v30  ;;  %v245_v46 = vsub.f32 %v235_v10, %v1365_v20  ;;  %v291_v7 = vsub.f32 %v284_v16, %v1362_v18  ;;  %v293_v42 = vsub.f32 %v283_v34, %v1367_v22 }
 0x199   :  { %v1529_v15 = vpop.eup %885  ;;  %v1557_v47 = vmul.f32 %v880_v49, %v327_v37  ;;  %v454_v45 = vadd.f32 %v453_v28, %v440_v53  ;;  %v451_v48 = vmul.f32 %v1479_v2, %v214_v30  ;;  %v244_v55 = vsub.f32 %v243_v29, %v238_v17 }
 0x19a   :  { %v1534_v25 = vpop.eup %887  ;;  %v389_v51 = vadd.f32 %v388_v33, %v376_v52  ;;  %v286_v56 = vmul.f32 0.6931472, %v1503_v38  ;;  %v394_v1 = vmul.f32 %v884_v5, %v391_v36  ;;  %v338_v49 = vsub.f32 %v331_v41, %v1355_v12 }
 0x19b   :  { %v1540_v23 = vpop.eup %889  ;;  %v340_v53 = vsub.f32 %v1557_v47, %v1370_v24  ;;  %v333_v12 = vmul.f32 0.6931472, %v1517_v57 }
 0x19c   :  { %v1547_v32 = vpop.eup %891  ;;  %v292_v52 = vsub.f32 %v291_v7, %v286_v56  ;;  %v393_v38 = vmul.f32 %v884_v5, %v389_v51  ;;  %v401_v41 = vsub.f32 %v394_v1, %v1389_v59  ;;  %v591_v5 = vmul.f32 %v1493_v21, %v214_v30 }
 0x19d   :  { %v894_v43 = vpop.eup %893  ;;  %v339_v57 = vsub.f32 %v338_v49, %v333_v12 }
 0x19e   :  { %v896_v13 = vpop.eup %895  ;;  %v240_v14 = vmul.f32 0.6931472, %v894_v43  ;;  %v403_v59 = vsub.f32 %v393_v38, %v1429_v19 }
 0x19f   :  { %v1560_v54 = vpop.eup %897  ;;  %v288_v0 = vmul.f32 0.6931472, %v896_v13 }
 0x1a0   :  { %v900_v3 = vpop.eup %899  ;;  %v241_v18 = vadd.f32 %v240_v14, %v1365_v20  ;;  %v246_v9 = vsub.f32 %v245_v46, %v240_v14  ;;  %v452_v14 = vadd.f32 %v451_v48, %v439_v26  ;;  %v515_v26 = vadd.f32 %v1543_v35, %v1520_v50 }
 0x1a1   :  { %v902_v16 = vpop.eup %901  ;;  %v289_v2 = vadd.f32 %v288_v0, %v1367_v22  ;;  %v294_v8 = vsub.f32 %v293_v42, %v288_v0  ;;  %v335_v28 = vmul.f32 0.6931472, %v900_v3  ;;  %v520_v3 = vmul.f32 %v1506_v40, %v1531_v4 }
 0x1a2   :  { %v904_v17 = vpop.eup %903  ;;  %v242_v37 = vsub.f32 %v241_v18, %v235_v10  ;;  %v247_v29 = vsub.f32 %v244_v55, %v246_v9  ;;  %v398_v36 = vmul.f32 0.6931472, %v902_v16  ;;  %v578_v10 = vadd.f32 %v577_v39, %v1523_v60 }
 0x1a3   :  { %v906_v33 = vpop.eup %905  ;;  %v290_v43 = vsub.f32 %v289_v2, %v283_v34  ;;  %v336_v20 = vadd.f32 %v335_v28, %v1370_v24  ;;  %v295_v7 = vsub.f32 %v292_v52, %v294_v8  ;;  %v341_v42 = vsub.f32 %v340_v53, %v335_v28 }
 0x1a4   :  { %v249_v46 = vsel %vm248_vm2, %v242_v37, 0.0  ;;  %v260_v22 = vsel %vm248_vm2, %v247_v29, 0.0  ;;  %v908_v13 = vpop.eup %907  ;;  %v399_v34 = vadd.f32 %v398_v36, %v1429_v19  ;;  %v396_v24 = vmul.f32 0.6931472, %v1529_v15 }
 0x1a5   :  { %250 = vadd.xlane.f32.xlu1 %v249_v46  ;;  %261 = vadd.xlane.f32.xlu0 %v260_v22  ;;  %v461_v51 = vmul.f32 0.6931472, %v906_v33  ;;  %v296_v55 = vsel %vm248_vm2, %v290_v43, 0.0  ;;  %v337_v0 = vsub.f32 %v336_v20, %v1557_v47  ;;  %v457_v60 = vmul.f32 %v1534_v25, %v454_v45 }
 0x1a6   :  { %v402_v56 = vsub.f32 %v401_v41, %v396_v24  ;;  %v307_v21 = vsel %vm248_vm2, %v295_v7, 0.0  ;;  %v342_v30 = vsub.f32 %v339_v57, %v341_v42  ;;  %v404_v39 = vsub.f32 %v403_v59, %v398_v36 }
 0x1a7   :  { %v456_v1 = vmul.f32 %v1534_v25, %v452_v14  ;;  %v400_v15 = vsub.f32 %v399_v34, %v393_v38  ;;  %v462_v19 = vadd.f32 %v461_v51, %v1443_v31  ;;  %v594_v47 = vadd.f32 %v1551_v61, %v1536_v58  ;;  %v130_v58 = vpop.xlane.xlu0 %129 }
 0x1a8   :  { %v464_v48 = vsub.f32 %v457_v60, %v1397_v62  ;;  %v343_v25 = vsel %vm248_vm2, %v337_v0, 0.0  ;;  %v405_v18 = vsub.f32 %v402_v56, %v404_v39  ;;  %v519_v9 = vmul.f32 %v1506_v40, %v515_v26 }
 0x1a9   :  { %297 = vadd.xlane.f32.xlu1 %v296_v55  ;;  %308 = vadd.xlane.f32.xlu0 %v307_v21  ;;  %v466_v45 = vsub.f32 %v456_v1, %v1443_v31  ;;  %v524_v49 = vmul.f32 0.6931472, %v904_v17  ;;  %v354_v53 = vsel %vm248_vm2, %v342_v30, 0.0  ;;  %v459_v50 = vmul.f32 0.6931472, %v1540_v23 }
 0x1aa   :  { %v592_v16 = vadd.f32 %v591_v5, %v578_v10  ;;  %v406_v62 = vsel %vm248_vm2, %v400_v15, 0.0  ;;  %v463_v31 = vsub.f32 %v462_v19, %v456_v1  ;;  %v529_v4 = vsub.f32 %v519_v9, %v1421_v11 }
 0x1ab   :  { %v467_v35 = vsub.f32 %v466_v45, %v461_v51  ;;  %v465_v61 = vsub.f32 %v464_v48, %v459_v50  ;;  %v527_v2 = vsub.f32 %v520_v3, %v1401_v63  ;;  %v597_v52 = vmul.f32 %v1547_v32, %v594_v47 }
 0x1ac   :  { %v596_v40 = vmul.f32 %v1547_v32, %v592_v16  ;;  %v417_v8 = vsel %vm248_vm2, %v405_v18, 0.0  ;;  %v525_v23 = vadd.f32 %v524_v49, %v1421_v11  ;;  %v522_v28 = vmul.f32 0.6931472, %v1510_v44 }
 0x1ad   :  { %344 = vadd.xlane.f32.xlu1 %v343_v25  ;;  %355 = vadd.xlane.f32.xlu0 %v354_v53  ;;  %v131_v17 = vrot.slane %v130_v58, 4  ;;  %v468_v37 = vsub.f32 %v465_v61, %v467_v35  ;;  %v530_v29 = vsub.f32 %v529_v4, %v524_v49  ;;  %v601_v38 = vmul.f32 0.6931472, %v908_v13 }
 0x1ae   :  { %v606_v36 = vsub.f32 %v596_v40, %v1437_v27  ;;  %v528_v63 = vsub.f32 %v527_v2, %v522_v28  ;;  %v604_v43 = vsub.f32 %v597_v52, %v1413_v6  ;;  %v469_v32 = vsel %vm248_vm2, %v463_v31, 0.0 }
 0x1af   :  { %v132_v33 = vadd.f32 %v131_v17, %v130_v58  ;;  %v526_v20 = vsub.f32 %v525_v23, %v519_v9  ;;  %v599_v12 = vmul.f32 0.6931472, %v1560_v54  ;;  %v480_v44 = vsel %vm248_vm2, %v468_v37, 0.0 }
 0x1b0   :  { %v531_v41 = vsub.f32 %v528_v63, %v530_v29  ;;  %v602_v46 = vadd.f32 %v601_v38, %v1437_v27  ;;  %v607_v22 = vsub.f32 %v606_v36, %v601_v38 }
 0x1b1   :  { %407 = vadd.xlane.f32.xlu1 %v406_v62  ;;  %418 = vadd.xlane.f32.xlu0 %v417_v8  ;;  %v133_v11 = vrot.slane %v132_v33, 2  ;;  %v605_v42 = vsub.f32 %v604_v43, %v599_v12  ;;  %v532_v10 = vsel %vm248_vm2, %v526_v20, 0.0 }
 0x1b2   :  { %v543_v6 = vsel %vm248_vm2, %v531_v41, 0.0  ;;  %v603_v5 = vsub.f32 %v602_v46, %v596_v40 }
 0x1b3   :  { %v134_v7 = vadd.f32 %v133_v11, %v132_v33  ;;  %v608_v34 = vsub.f32 %v605_v42, %v607_v22 }
 0x1b4   :  { %v609_v24 = vsel %vm248_vm2, %v603_v5, 0.0 }
 0x1b5   :  { %470 = vadd.xlane.f32.xlu1 %v469_v32  ;;  %481 = vadd.xlane.f32.xlu0 %v480_v44  ;;  %v135_v13 = vrot.slane %v134_v7, 1  ;;  %v620_v27 = vsel %vm248_vm2, %v608_v34, 0.0 }
 0x1b7   :  { %v136_v54 = vadd.f32 %v135_v13, %v134_v7 }
 0x1b9   :  { %533 = vadd.xlane.f32.xlu1 %v532_v10  ;;  %544 = vadd.xlane.f32.xlu0 %v543_v6  ;;  %762 = vpush %v136_v54 }
 0x1bd   :  { %610 = vadd.xlane.f32.xlu1 %v609_v24  ;;  %621 = vadd.xlane.f32.xlu0 %v620_v27 }
 0x1ea   :  { %s763_s5 = spop %762 }
 0x1eb   :  { %s138_s1 = smul.f32 0.0013020834, %s763_s5 }
 0x1ed   :  { %v632_v57 = vstv %s138_s1 }
 0x1ee   :  { %634 = vst.msk [vmem:[#allocation14] sm:$0x1] %vm633_vm3, %v632_v57 }
 0x1ef   :  { %1060 = shalt.err (!%p1057_p11)
}
 0x1f0   :  { %658 = dma.vmem_to_hbm [thread:$0]  %s656_s19, 16, %s1702_s8, [#allocation4]  }
 0x1f1   :  { %s1235_s8 = smov [#allocation15]   ;;  %s1236_s27 = smov [#allocation18]  }
 0x1f2   :  { %s665_s23 = sshll.u32 %s1235_s8, 4  ;;  %s685_s0 = sshll.u32 %s1236_s27, 4  ;;  %s1618_s23 = int_to_ptr.vmem [resolvable:$true] %s665_s23  ;;  %s1620_s0 = int_to_ptr.vmem [resolvable:$true] %s685_s0 }
 0x1f3   :  { %s1237_s28 = smov [#allocation21]   ;;  %s1238_s7 = smov [#allocation17]  }
 0x1f4   :  { %s705_s29 = sshll.u32 %s1237_s28, 4  ;;  %s675_s5 = sshll.u32 %s1238_s7, 4  ;;  %s1623_s29 = int_to_ptr.vmem [resolvable:$true] %s705_s29  ;;  %s676_s5 = int_to_ptr.vmem [resolvable:$true] %s675_s5 }
 0x1f5   :  { %s1069_s21 = scalar_lea.vmem %s1618_s23, 16  ;;  %s1073_s22 = scalar_lea.vmem %s1618_s23, 32 }
 0x1f6   :  { %p1070_p12 = scmp.ne.s32.totalorder %s1618_s23, %s1069_s21  ;;  %p1074_p13 = scmp.lt.s32.totalorder %s1618_s23, %s1618_s23 }
 0x1f7   :  { %p1075_p0 = scmp.lt.s32.totalorder %s1073_s22, %s1069_s21 }
 0x1f9   :  { %p1076_p1 = por %p1075_p0, %p1074_p13 }
 0x1fb   :  { %p1077_p2 = pnand %p1076_p1, %p1070_p12 }
 0x22e   :  { %v251_v59 = vpop.xlane.xlu1 %250  ;;  %v262_v14 = vpop.xlane.xlu0 %261 }
 0x22f   :  { %v252_v51 = vrot.slane %v251_v59, 4  ;;  %v263_v55 = vrot.slane %v262_v14, 4 }
 0x231   :  { %v253_v0 = vadd.f32 %v252_v51, %v251_v59  ;;  %v264_v56 = vadd.f32 %v263_v55, %v262_v14 }
 0x232   :  { %v298_v60 = vpop.xlane.xlu1 %297  ;;  %v309_v21 = vpop.xlane.xlu0 %308 }
 0x233   :  { %v254_v30 = vrot.slane %v253_v0, 2  ;;  %v265_v39 = vrot.slane %v264_v56, 2  ;;  %v299_v1 = vrot.slane %v298_v60, 4  ;;  %v310_v15 = vrot.slane %v309_v21, 4 }
 0x235   :  { %v300_v19 = vadd.f32 %v299_v1, %v298_v60  ;;  %v311_v26 = vadd.f32 %v310_v15, %v309_v21  ;;  %v255_v47 = vadd.f32 %v254_v30, %v253_v0  ;;  %v266_v48 = vadd.f32 %v265_v39, %v264_v56 }
 0x236   :  { %v345_v45 = vpop.xlane.xlu1 %344  ;;  %v356_v3 = vpop.xlane.xlu0 %355 }
 0x237   :  { %v301_v25 = vrot.slane %v300_v19, 2  ;;  %v312_v18 = vrot.slane %v311_v26, 2  ;;  %v346_v9 = vrot.slane %v345_v45, 4  ;;  %v357_v49 = vrot.slane %v356_v3, 4 }
 0x238   :  { %v256_v53 = vrot.slane %v255_v47, 1  ;;  %v267_v50 = vrot.slane %v266_v48, 1 }
 0x239   :  { %v347_v35 = vadd.f32 %v346_v9, %v345_v45  ;;  %v358_v16 = vadd.f32 %v357_v49, %v356_v3  ;;  %v302_v58 = vadd.f32 %v301_v25, %v300_v19  ;;  %v313_v62 = vadd.f32 %v312_v18, %v311_v26 }
 0x23a   :  { %v408_v31 = vpop.xlane.xlu1 %407  ;;  %v419_v4 = vpop.xlane.xlu0 %418  ;;  %v257_v61 = vadd.f32 %v256_v53, %v255_v47  ;;  %v268_v2 = vadd.f32 %v267_v50, %v266_v48 }
 0x23b   :  { %v348_v40 = vrot.slane %v347_v35, 2  ;;  %v359_v52 = vrot.slane %v358_v16, 2  ;;  %v409_v8 = vrot.slane %v408_v31, 4  ;;  %v420_v23 = vrot.slane %v419_v4, 4 }
 0x23c   :  { %764 = vpush %v257_v61  ;;  %v303_v28 = vrot.slane %v302_v58, 1  ;;  %v314_v17 = vrot.slane %v313_v62, 1 }
 0x23d   :  { %v410_v37 = vadd.f32 %v409_v8, %v408_v31  ;;  %v421_v29 = vadd.f32 %v420_v23, %v419_v4  ;;  %766 = vpush %v268_v2  ;;  %v349_v38 = vadd.f32 %v348_v40, %v347_v35  ;;  %v360_v36 = vadd.f32 %v359_v52, %v358_v16 }
 0x23e   :  { %v471_v33 = vpop.xlane.xlu1 %470  ;;  %v482_v63 = vpop.xlane.xlu0 %481  ;;  %v304_v43 = vadd.f32 %v303_v28, %v302_v58  ;;  %v315_v32 = vadd.f32 %v314_v17, %v313_v62 }
 0x23f   :  { %v411_v20 = vrot.slane %v410_v37, 2  ;;  %v422_v12 = vrot.slane %v421_v29, 2  ;;  %v472_v11 = vrot.slane %v471_v33, 4  ;;  %v483_v44 = vrot.slane %v482_v63, 4 }
 0x240   :  { %768 = vpush %v304_v43  ;;  %v350_v41 = vrot.slane %v349_v38, 1  ;;  %v361_v46 = vrot.slane %v360_v36, 1 }
 0x241   :  { %v473_v22 = vadd.f32 %v472_v11, %v471_v33  ;;  %v484_v7 = vadd.f32 %v483_v44, %v482_v63  ;;  %770 = vpush %v315_v32  ;;  %v412_v42 = vadd.f32 %v411_v20, %v410_v37  ;;  %v423_v13 = vadd.f32 %v422_v12, %v421_v29 }
 0x242   :  { %v534_v10 = vpop.xlane.xlu1 %533  ;;  %v545_v6 = vpop.xlane.xlu0 %544  ;;  %v351_v5 = vadd.f32 %v350_v41, %v349_v38  ;;  %v362_v34 = vadd.f32 %v361_v46, %v360_v36 }
 0x243   :  { %v474_v54 = vrot.slane %v473_v22, 2  ;;  %v485_v24 = vrot.slane %v484_v7, 2  ;;  %v535_v27 = vrot.slane %v534_v10, 4  ;;  %v546_v57 = vrot.slane %v545_v6, 4 }
 0x244   :  { %772 = vpush %v351_v5  ;;  %v413_v59 = vrot.slane %v412_v42, 1  ;;  %v424_v14 = vrot.slane %v423_v13, 1 }
 0x245   :  { %v536_v51 = vadd.f32 %v535_v27, %v534_v10  ;;  %v547_v55 = vadd.f32 %v546_v57, %v545_v6  ;;  %774 = vpush %v362_v34  ;;  %v475_v0 = vadd.f32 %v474_v54, %v473_v22  ;;  %v486_v56 = vadd.f32 %v485_v24, %v484_v7 }
 0x246   :  { %v611_v60 = vpop.xlane.xlu1 %610  ;;  %v622_v21 = vpop.xlane.xlu0 %621  ;;  %v414_v30 = vadd.f32 %v413_v59, %v412_v42  ;;  %v425_v39 = vadd.f32 %v424_v14, %v423_v13 }
 0x247   :  { %v537_v1 = vrot.slane %v536_v51, 2  ;;  %v548_v15 = vrot.slane %v547_v55, 2  ;;  %v612_v19 = vrot.slane %v611_v60, 4  ;;  %v623_v26 = vrot.slane %v622_v21, 4 }
 0x248   :  { %776 = vpush %v414_v30  ;;  %v476_v47 = vrot.slane %v475_v0, 1  ;;  %v487_v48 = vrot.slane %v486_v56, 1 }
 0x249   :  { %v613_v45 = vadd.f32 %v612_v19, %v611_v60  ;;  %v624_v3 = vadd.f32 %v623_v26, %v622_v21  ;;  %778 = vpush %v425_v39  ;;  %v538_v25 = vadd.f32 %v537_v1, %v536_v51  ;;  %v549_v18 = vadd.f32 %v548_v15, %v547_v55 }
 0x24a   :  { %v477_v9 = vadd.f32 %v476_v47, %v475_v0  ;;  %v488_v49 = vadd.f32 %v487_v48, %v486_v56 }
 0x24b   :  { %v614_v53 = vrot.slane %v613_v45, 2  ;;  %v625_v50 = vrot.slane %v624_v3, 2  ;;  %v539_v35 = vrot.slane %v538_v25, 1  ;;  %v550_v16 = vrot.slane %v549_v18, 1 }
 0x24c   :  { %780 = vpush %v477_v9 }
 0x24d   :  { %v615_v58 = vadd.f32 %v614_v53, %v613_v45  ;;  %v626_v62 = vadd.f32 %v625_v50, %v624_v3  ;;  %782 = vpush %v488_v49  ;;  %v540_v31 = vadd.f32 %v539_v35, %v538_v25  ;;  %v551_v4 = vadd.f32 %v550_v16, %v549_v18 }
 0x24f   :  { %784 = vpush %v540_v31  ;;  %v616_v61 = vrot.slane %v615_v58, 1  ;;  %v627_v2 = vrot.slane %v626_v62, 1 }
 0x250   :  { %786 = vpush %v551_v4 }
 0x251   :  { %v617_v40 = vadd.f32 %v616_v61, %v615_v58  ;;  %v628_v52 = vadd.f32 %v627_v2, %v626_v62 }
 0x253   :  { %788 = vpush %v617_v40 }
 0x254   :  { %790 = vpush %v628_v52 }
 0x26d   :  { %s765_s24 = spop %764 }
 0x26e   :  { %s259_s25 = smul.f32 0.125, %s765_s24  ;;  %s767_s6 = spop %766 }
 0x26f   :  { %s270_s26 = smul.f32 0.0078125, %s767_s6 }
 0x271   :  { %s271_s30 = ssub.f32 %s259_s25, %s270_s26  ;;  %s769_s16 = spop %768 }
 0x272   :  { %s306_s2 = smul.f32 0.125, %s769_s16  ;;  %s771_s17 = spop %770 }
 0x273   :  { %v635_v8 = vstv %s271_s30  ;;  %s317_s4 = smul.f32 0.0078125, %s771_s17 }
 0x274   :  { %636 = vst.msk [vmem:[#allocation15] sm:$0x1] %vm633_vm3, %v635_v8 }
 0x275   :  { %s318_s1 = ssub.f32 %s306_s2, %s317_s4  ;;  %s773_s18 = spop %772 }
 0x276   :  { %s353_s19 = smul.f32 0.125, %s773_s18  ;;  %s775_s3 = spop %774 }
 0x277   :  { %v637_v23 = vstv %s318_s1  ;;  %s364_s20 = smul.f32 0.0078125, %s775_s3 }
 0x278   :  { %1080 = shalt.err (!%p1077_p2)
}
 0x279   :  { %668 = dma.vmem_to_hbm [thread:$0]  %s1618_s23, 16, %s1703_s9, [#allocation16]   ;;  %638 = vst.msk [vmem:[#allocation17] sm:$0x1] %vm633_vm3, %v637_v23 }
 0x27a   :  { %s365_s25 = ssub.f32 %s353_s19, %s364_s20  ;;  %s777_s6 = spop %776 }
 0x27b   :  { %s416_s26 = smul.f32 0.125, %s777_s6  ;;  %s779_s27 = spop %778 }
 0x27c   :  { %v639_v28 = vstv %s365_s25  ;;  %s427_s28 = smul.f32 0.00390625, %s779_s27  ;;  %s1089_s30 = scalar_lea.vmem %s676_s5, 16 }
 0x27d   :  { %640 = vst.msk [vmem:[#allocation18] sm:$0x1] %vm633_vm3, %v639_v28  ;;  %p1090_p3 = scmp.ne.s32.totalorder %s676_s5, %s1089_s30  ;;  %s1093_s16 = scalar_lea.vmem %s676_s5, 32 }
 0x27e   :  { %p1094_p4 = scmp.lt.s32.totalorder %s676_s5, %s676_s5  ;;  %p1095_p5 = scmp.lt.s32.totalorder %s1093_s16, %s1089_s30 }
 0x280   :  { %p1096_p6 = por %p1095_p5, %p1094_p4 }
 0x282   :  { %p1097_p7 = pnand %p1096_p6, %p1090_p3 }
 0x284   :  { %1100 = shalt.err (!%p1097_p7)
}
 0x285   :  { %678 = dma.vmem_to_hbm [thread:$0]  %s676_s5, 16, %s1704_s10, [#allocation16]  }
 0x286   :  { %s428_s23 = ssub.f32 %s416_s26, %s427_s28  ;;  %s781_s17 = spop %780 }
 0x287   :  { %s479_s4 = smul.f32 0.125, %s781_s17  ;;  %s783_s7 = spop %782 }
 0x288   :  { %v641_v17 = vstv %s428_s23  ;;  %s490_s1 = smul.f32 0.00390625, %s783_s7  ;;  %s1239_s18 = smov [#allocation20]  }
 0x289   :  { %s695_s19 = sshll.u32 %s1239_s18, 4  ;;  %s785_s3 = spop %784  ;;  %642 = vst.msk [vmem:[#allocation20] sm:$0x1] %vm633_vm3, %v641_v17  ;;  %s1640_s19 = int_to_ptr.vmem [resolvable:$true] %s695_s19 }
 0x28a   :  { %s491_s20 = ssub.f32 %s479_s4, %s490_s1  ;;  %s542_s21 = smul.f32 0.125, %s785_s3 }
 0x28b   :  { %s787_s22 = spop %786  ;;  %s1240_s8 = smov [#allocation23]  }
 0x28c   :  { %v643_v37 = vstv %s491_s20  ;;  %s553_s10 = smul.f32 0.00390625, %s787_s22  ;;  %s789_s5 = spop %788 }
 0x28d   :  { %644 = vst.msk [vmem:[#allocation21] sm:$0x1] %vm633_vm3, %v643_v37  ;;  %s715_s24 = sshll.u32 %s1240_s8, 4  ;;  %s619_s6 = smul.f32 0.125, %s789_s5  ;;  %s1643_s24 = int_to_ptr.vmem [resolvable:$true] %s715_s24 }
 0x28e   :  { %s554_s25 = ssub.f32 %s542_s21, %s553_s10  ;;  %s791_s26 = spop %790 }
 0x28f   :  { %s1241_s27 = smov [#allocation24]   ;;  %s630_s30 = smul.f32 0.0026041667, %s791_s26 }
 0x290   :  { %s725_s28 = sshll.u32 %s1241_s27, 4  ;;  %v645_v29 = vstv %s554_s25  ;;  %s1109_s16 = scalar_lea.vmem %s1620_s0, 16  ;;  %s1655_s28 = int_to_ptr.vmem [resolvable:$true] %s725_s28 }
 0x291   :  { %646 = vst.msk [vmem:[#allocation23] sm:$0x1] %vm633_vm3, %v645_v29  ;;  %p1110_p8 = scmp.ne.s32.totalorder %s1620_s0, %s1109_s16  ;;  %s1113_s2 = scalar_lea.vmem %s1620_s0, 32 }
 0x292   :  { %p1114_p9 = scmp.lt.s32.totalorder %s1620_s0, %s1620_s0  ;;  %p1115_p10 = scmp.lt.s32.totalorder %s1113_s2, %s1109_s16 }
 0x294   :  { %p1116_p11 = por %p1115_p10, %p1114_p9 }
 0x296   :  { %p1117_p12 = pnand %p1116_p11, %p1110_p8 }
 0x298   :  { %1120 = shalt.err (!%p1117_p12)
}
 0x299   :  { %688 = dma.vmem_to_hbm [thread:$0]  %s1620_s0, 16, %s1705_s11, [#allocation19]  }
 0x29a   :  { %s631_s17 = ssub.f32 %s619_s6, %s630_s30  ;;  %s1129_s4 = scalar_lea.vmem %s1623_s29, 16 }
 0x29b   :  { %p1130_p13 = scmp.ne.s32.totalorder %s1623_s29, %s1129_s4  ;;  %s1133_s7 = scalar_lea.vmem %s1623_s29, 32 }
 0x29c   :  { %p1134_p0 = scmp.lt.s32.totalorder %s1623_s29, %s1623_s29  ;;  %p1135_p1 = scmp.lt.s32.totalorder %s1133_s7, %s1129_s4 }
 0x29e   :  { %p1136_p2 = por %p1135_p1, %p1134_p0 }
 0x2a0   :  { %p1137_p3 = pnand %p1136_p2, %p1130_p13 }
 0x2a2   :  { %1140 = shalt.err (!%p1137_p3)
}
 0x2a3   :  { %708 = dma.vmem_to_hbm [thread:$0]  %s1623_s29, 16, %s1707_s13, [#allocation22]   ;;  %v647_v38 = vstv %s631_s17 }
 0x2a4   :  { %s1149_s11 = scalar_lea.vmem %s1640_s19, 16  ;;  %s1153_s0 = scalar_lea.vmem %s1640_s19, 32 }
 0x2a5   :  { %p1150_p4 = scmp.ne.s32.totalorder %s1640_s19, %s1149_s11  ;;  %p1154_p5 = scmp.lt.s32.totalorder %s1640_s19, %s1640_s19 }
 0x2a6   :  { %p1155_p6 = scmp.lt.s32.totalorder %s1153_s0, %s1149_s11 }
 0x2a8   :  { %p1156_p7 = por %p1155_p6, %p1154_p5 }
 0x2aa   :  { %p1157_p8 = pnand %p1156_p7, %p1150_p4 }
 0x2ac   :  { %1160 = shalt.err (!%p1157_p8)
}
 0x2ad   :  { %698 = dma.vmem_to_hbm [thread:$0]  %s1640_s19, 16, %s1706_s12, [#allocation19]   ;;  %648 = vst.msk [vmem:[#allocation24] sm:$0x1] %vm633_vm3, %v647_v38 }
 0x2ae   :  { %s1169_s13 = scalar_lea.vmem %s1643_s24, 16  ;;  %s1173_s29 = scalar_lea.vmem %s1643_s24, 32 }
 0x2af   :  { %p1170_p9 = scmp.ne.s32.totalorder %s1643_s24, %s1169_s13  ;;  %p1174_p10 = scmp.lt.s32.totalorder %s1643_s24, %s1643_s24 }
 0x2b0   :  { %p1175_p11 = scmp.lt.s32.totalorder %s1173_s29, %s1169_s13 }
 0x2b2   :  { %p1176_p12 = por %p1175_p11, %p1174_p10 }
 0x2b4   :  { %p1177_p13 = pnand %p1176_p12, %p1170_p9 }
 0x2b6   :  { %1180 = shalt.err (!%p1177_p13)
}
 0x2b7   :  { %718 = dma.vmem_to_hbm [thread:$0]  %s1643_s24, 16, %s1708_s14, [#allocation22]  }
 0x2b8   :  { %s1189_s12 = scalar_lea.vmem %s1655_s28, 16  ;;  %s1193_s19 = scalar_lea.vmem %s1655_s28, 32 }
 0x2b9   :  { %p1190_p0 = scmp.ne.s32.totalorder %s1655_s28, %s1189_s12  ;;  %p1194_p1 = scmp.lt.s32.totalorder %s1655_s28, %s1655_s28 }
 0x2ba   :  { %p1195_p2 = scmp.lt.s32.totalorder %s1193_s19, %s1189_s12 }
 0x2bc   :  { %p1196_p3 = por %p1195_p2, %p1194_p1 }
 0x2be   :  { %p1197_p4 = pnand %p1196_p3, %p1190_p0 }
 0x2c0   :  { %1200 = shalt.err (!%p1197_p4)
}
 0x2c1   :  { %728 = dma.vmem_to_hbm [thread:$0]  %s1655_s28, 16, %s1709_s15, [#allocation25]  }
 0x2c2   :  { %1217 = dma.done.wait [#allocation4], 16  }
 0x2c3   :  { %1218 = vsyncadd [#allocation4], 4294967280 }
 0x2c4   :  { %1219 = dma.done.wait [#allocation16], 32  }
 0x2c5   :  { %1220 = vsyncadd [#allocation16], 4294967264 }
 0x2c6   :  { %1221 = dma.done.wait [#allocation19], 32  }
 0x2c7   :  { %1222 = vsyncadd [#allocation19], 4294967264 }
 0x2c8   :  { %1223 = dma.done.wait [#allocation22], 32  }
 0x2c9   :  { %1224 = vsyncadd [#allocation22], 4294967264 }
 0x2ca   :  { %1225 = dma.done.wait [#allocation25], 16  }
 0x2cb   :  { %1226 = vsyncadd [#allocation25], 4294967280 }
 0x2cc   :  { %753 = vsyncpa [#allocation3], 1 }
 0x2cd   :  { %754 = vsyncpa [#allocation6], 1 }
 0x2ce   :  { %755 = vsyncpa [#allocation9], 1 }
 0x2cf   :  { %756 = vsyncpa [#allocation12], 1 }
 0x2d0   :  { %757 = vsyncpa [#allocation4], 1 }
 0x2d1   :  { %758 = vsyncpa [#allocation16], 1 }
 0x2d2   :  { %759 = vsyncpa [#allocation19], 1 }
 0x2d3   :  { %760 = vsyncpa [#allocation22], 1 }
 0x2d4   :  { %761 = vsyncpa [#allocation25], 1 }

</bundles_post_ra>
